<compile_context>
chip_gen: v7x
topology: tpu7x:2x2x1
jax: 0.10.0
libtpu: 0.0.40
codegen_flags: <defaults>
</compile_context>

<pallas_src>
import functools

import jax
import jax.numpy as jnp
from jax.experimental import pallas as pl
from jax.experimental.pallas import tpu as pltpu

LANE = 128


def _round_up(n, m):
    return ((n + m - 1) // m) * m


def _mlp_kernel(x_ref, w1_ref, b1_ref, w2_ref, b2_ref, w3_ref, b3_ref, o_ref):
    """One batch tile of the fused 3-layer MLP, entirely in VMEM.

    x_ref:  (bm, F)   f32  -- cast to bf16 in-kernel (no wrapper pad/cast pass)
    w*_ref: (in, out) bf16 -- pre-converted once by prepare_params(), resident
    b*_ref: (1, out)  f32
    o_ref:  (bm, 128) f32  -- lane-dense padded logits
    """
    x = x_ref[...].astype(jnp.bfloat16)

    # hidden_layer1: Linear + ReLU (bf16 MXU matmul, f32 accumulate)
    h1 = jnp.dot(x, w1_ref[...], preferred_element_type=jnp.float32)
    h1 = jnp.maximum(h1 + b1_ref[...], 0.0)

    # hidden_layer2: Linear + ReLU
    h2 = jnp.dot(h1.astype(jnp.bfloat16), w2_ref[...],
                 preferred_element_type=jnp.float32)
    h2 = jnp.maximum(h2 + b2_ref[...], 0.0)

    # output_layer: Linear (no activation), lane-dense (bm, 128) store
    logits = jnp.dot(h2.astype(jnp.bfloat16), w3_ref[...],
                     preferred_element_type=jnp.float32)
    o_ref[...] = (logits + b3_ref[...]).astype(o_ref.dtype)


def prepare_params(w1, b1, w2, b2, w3, b3):
    """One-time (init-time) parameter conversion, hoisted out of the hot path.

    * weights cast to bf16 (native MXU rate, half the weight HBM traffic)
    * output layer zero-padded 10 -> 128 columns (lane-dense final store)
    * biases kept f32, shaped (1, out) for broadcast after f32 accumulation
    Zero padding leaves the math unchanged; the wrapper slices logits back.
    """
    out_features = w3.shape[1]
    np_ = _round_up(out_features, LANE)
    bf16 = jnp.bfloat16
    return (
        w1.astype(bf16),
        jnp.asarray(b1, jnp.float32).reshape(1, -1),
        w2.astype(bf16),
        jnp.asarray(b2, jnp.float32).reshape(1, -1),
        jnp.pad(w3, ((0, 0), (0, np_ - out_features))).astype(bf16),
        jnp.pad(jnp.asarray(b3, jnp.float32).reshape(1, -1),
                ((0, 0), (0, np_ - out_features))),
    )


@functools.partial(jax.jit, static_argnames=("out_features", "block_batch"))
def dnn_forward(x, params, *, out_features, block_batch=512):
    """y = relu(relu(x @ w1 + b1) @ w2 + b2) @ w3 + b3   (weights stored (in, out)).

    `params` must come from prepare_params().  x is passed unpadded f32 and
    cast to bf16 inside the kernel.
    """
    w1, b1, w2, b2, w3, b3 = params
    B, F = x.shape
    H1 = w1.shape[1]
    H2 = w2.shape[1]
    Np = w3.shape[1]                      # already lane-padded (e.g. 10 -> 128)

    # Batch tile: as large as requested but no larger than the (sublane-rounded)
    # batch.  The last grid tile may be partial: rows are independent, OOB rows
    # are masked on store and sliced away, and the contraction axis is exact.
    bm = min(block_batch, _round_up(B, 8))
    grid = (pl.cdiv(B, bm),)

    # Weights/biases: constant block index -> DMA'd once, resident in VMEM
    # across every batch tile while x/out are pipelined.
    resident = lambda shape: pl.BlockSpec(shape, lambda i: (0, 0))

    cost = pl.CostEstimate(
        flops=2 * B * (F * H1 + H1 * H2 + H2 * Np),
        transcendentals=0,
        bytes_accessed=(x.size * x.dtype.itemsize          # read x (f32)
                        + B * Np * 4                        # write padded logits
                        + (w1.size + w2.size + w3.size) * 2 # bf16 weights, once
                        + (b1.size + b2.size + b3.size) * 4),
    )

    out = pl.pallas_call(
        _mlp_kernel,
        out_shape=jax.ShapeDtypeStruct((B, Np), jnp.float32),
        grid_spec=pltpu.PrefetchScalarGridSpec(
            num_scalar_prefetch=0,
            grid=grid,
            in_specs=[
                # x: full feature dim (784 == full array dim, so no padding).
                pl.BlockSpec((bm, F), lambda i: (i, 0)),
                resident(w1.shape), resident(b1.shape),
                resident(w2.shape), resident(b2.shape),
                resident(w3.shape), resident(b3.shape),
            ],
            out_specs=pl.BlockSpec((bm, Np), lambda i: (i, 0)),
        ),
        compiler_params=pltpu.CompilerParams(
            dimension_semantics=("parallel",),
            vmem_limit_bytes=32 << 20,     # ~13 MiB footprint at bm=1024
        ),
        cost_estimate=cost,
    )(x, w1, b1, w2, b2, w3, b3)

    # No batch padding -> only trim the lane padding.
    return out[:, :out_features]


def init_linear_params(key, in_features, out_features):
    """Deterministic init mirroring torch.nn.Linear default U(-1/sqrt(in), 1/sqrt(in))."""
    kw, kb = jax.random.split(key)
    bound = 1.0 / (in_features ** 0.5)
    # Stored as (in, out) so the kernel does x @ W  (== x @ W_torch.T).
    w = jax.random.uniform(kw, (in_features, out_features), jnp.float32,
                           minval=-bound, maxval=bound)
    b = jax.random.uniform(kb, (1, out_features), jnp.float32,
                           minval=-bound, maxval=bound)
    return w, b


def _reference_bf16(x, w1, b1, w2, b2, w3, b3):
    """Plain-JAX reference with the same bf16-operand / f32-accumulate recipe."""
    c = lambda a: a.astype(jnp.bfloat16)
    h1 = jnp.maximum(jnp.dot(c(x), c(w1), preferred_element_type=jnp.float32) + b1, 0.0)
    h2 = jnp.maximum(jnp.dot(c(h1), c(w2), preferred_element_type=jnp.float32) + b2, 0.0)
    return jnp.dot(c(h2), c(w3), preferred_element_type=jnp.float32) + b3


if __name__ == "__main__":
    num_features = 784   # flattened 28x28 MNIST image
    batch = 200          # with block_batch=128: 2 grid tiles, last one partial

    key = jax.random.PRNGKey(0)
    kx, k1, k2, k3 = jax.random.split(key, 4)

    x = jax.random.normal(kx, (batch, num_features), jnp.float32)
    w1, b1 = init_linear_params(k1, num_features, 256)
    w2, b2 = init_linear_params(k2, 256, 128)
    w3, b3 = init_linear_params(k3, 128, 10)

    # One-time parameter conversion (hoisted out of the per-call forward path).
    params = jax.block_until_ready(prepare_params(w1, b1, w2, b2, w3, b3))

    out = dnn_forward(x, params, out_features=10, block_batch=128)
    out = jax.block_until_ready(out)
    assert out.shape == (batch, 10)

    # Tight check against a reference using the identical bf16 recipe.
    ref_bf16 = _reference_bf16(x, w1, b1, w2, b2, w3, b3)
    assert jnp.allclose(out, ref_bf16, atol=2e-3, rtol=2e-3), (
        float(jnp.max(jnp.abs(out - ref_bf16))))

    # Loose check against the full-f32 PyTorch-equivalent math
    # (bf16 weights/activations are a deliberate precision trade-off).
    ref_f32 = jnp.maximum(x @ w1 + b1, 0.0)
    ref_f32 = jnp.maximum(ref_f32 @ w2 + b2, 0.0)
    ref_f32 = ref_f32 @ w3 + b3
    assert jnp.allclose(out, ref_f32, atol=5e-2, rtol=5e-2), (
        float(jnp.max(jnp.abs(out - ref_f32))))

    print("KERNEL_OK")
</pallas_src>

<mosaic_0001>
module attributes {stable_mosaic.version = 11 : i64} {
  func.func @_mlp_kernel(%arg0: i32, %arg1: memref<128x784xf32, #tpu.memory_space<vmem>>, %arg2: memref<784x256xbf16, #tpu.memory_space<vmem>>, %arg3: memref<1x256xf32, #tpu.memory_space<vmem>>, %arg4: memref<256x128xbf16, #tpu.memory_space<vmem>>, %arg5: memref<1x128xf32, #tpu.memory_space<vmem>>, %arg6: memref<128x128xbf16, #tpu.memory_space<vmem>>, %arg7: memref<1x128xf32, #tpu.memory_space<vmem>>, %arg8: memref<128x128xf32, #tpu.memory_space<vmem>>) attributes {dimension_semantics = [#tpu.dimension_semantics<parallel>], iteration_bounds = array<i64: 2>, scalar_prefetch = 0 : i64, scratch_operands = 0 : i64, tpu.core_type = #tpu.core_type<tc>, window_params = [{transform_indices = @transform_0, window_bounds = array<i64: 128, 784>}, {pipeline_mode = #tpu.pipeline_mode<synchronous>, transform_indices = @transform_1, window_bounds = array<i64: 784, 256>}, {pipeline_mode = #tpu.pipeline_mode<synchronous>, transform_indices = @transform_2, window_bounds = array<i64: 1, 256>}, {pipeline_mode = #tpu.pipeline_mode<synchronous>, transform_indices = @transform_3, window_bounds = array<i64: 256, 128>}, {pipeline_mode = #tpu.pipeline_mode<synchronous>, transform_indices = @transform_4, window_bounds = array<i64: 1, 128>}, {pipeline_mode = #tpu.pipeline_mode<synchronous>, transform_indices = @transform_5, window_bounds = array<i64: 128, 128>}, {pipeline_mode = #tpu.pipeline_mode<synchronous>, transform_indices = @transform_6, window_bounds = array<i64: 1, 128>}, {transform_indices = @transform_7, window_bounds = array<i64: 128, 128>}]} {
    %c0 = arith.constant 0 : index
    %c0_0 = arith.constant 0 : index
    %0 = vector.load %arg1[%c0, %c0_0] : memref<128x784xf32, #tpu.memory_space<vmem>>, vector<128x784xf32>
    %1 = arith.truncf %0 : vector<128x784xf32> to vector<128x784xbf16>
    %c0_1 = arith.constant 0 : index
    %c0_2 = arith.constant 0 : index
    %2 = vector.load %arg2[%c0_1, %c0_2] : memref<784x256xbf16, #tpu.memory_space<vmem>>, vector<784x256xbf16>
    %cst = arith.constant dense<0.000000e+00> : vector<128x256xf32>
    %3 = tpu.matmul %1, %2, %cst {dimension_numbers = #tpu.dot_dimension_numbers<[1], [0], [0], [1], [0, 0, 1, 1], [], []>} : vector<128x784xbf16>, vector<784x256xbf16>, vector<128x256xf32> -> vector<128x256xf32>
    %c0_3 = arith.constant 0 : index
    %c0_4 = arith.constant 0 : index
    %4 = vector.load %arg3[%c0_3, %c0_4] : memref<1x256xf32, #tpu.memory_space<vmem>>, vector<1x256xf32>
    %5 = vector.broadcast %4 : vector<1x256xf32> to vector<128x256xf32>
    %6 = arith.addf %3, %5 : vector<128x256xf32>
    %cst_5 = arith.constant 0.000000e+00 : f32
    %7 = vector.broadcast %cst_5 : f32 to vector<128x256xf32>
    %8 = arith.maximumf %6, %7 : vector<128x256xf32>
    %9 = arith.truncf %8 : vector<128x256xf32> to vector<128x256xbf16>
    %c0_6 = arith.constant 0 : index
    %c0_7 = arith.constant 0 : index
    %10 = vector.load %arg4[%c0_6, %c0_7] : memref<256x128xbf16, #tpu.memory_space<vmem>>, vector<256x128xbf16>
    %cst_8 = arith.constant dense<0.000000e+00> : vector<128x128xf32>
    %11 = tpu.matmul %9, %10, %cst_8 {dimension_numbers = #tpu.dot_dimension_numbers<[1], [0], [0], [1], [0, 0, 1, 1], [], []>} : vector<128x256xbf16>, vector<256x128xbf16>, vector<128x128xf32> -> vector<128x128xf32>
    %c0_9 = arith.constant 0 : index
    %c0_10 = arith.constant 0 : index
    %12 = vector.load %arg5[%c0_9, %c0_10] : memref<1x128xf32, #tpu.memory_space<vmem>>, vector<1x128xf32>
    %13 = vector.broadcast %12 : vector<1x128xf32> to vector<128x128xf32>
    %14 = arith.addf %11, %13 : vector<128x128xf32>
    %cst_11 = arith.constant 0.000000e+00 : f32
    %15 = vector.broadcast %cst_11 : f32 to vector<128x128xf32>
    %16 = arith.maximumf %14, %15 : vector<128x128xf32>
    %17 = arith.truncf %16 : vector<128x128xf32> to vector<128x128xbf16>
    %c0_12 = arith.constant 0 : index
    %c0_13 = arith.constant 0 : index
    %18 = vector.load %arg6[%c0_12, %c0_13] : memref<128x128xbf16, #tpu.memory_space<vmem>>, vector<128x128xbf16>
    %cst_14 = arith.constant dense<0.000000e+00> : vector<128x128xf32>
    %19 = tpu.matmul %17, %18, %cst_14 {dimension_numbers = #tpu.dot_dimension_numbers<[1], [0], [0], [1], [0, 0, 1, 1], [], []>} : vector<128x128xbf16>, vector<128x128xbf16>, vector<128x128xf32> -> vector<128x128xf32>
    %c0_15 = arith.constant 0 : index
    %c0_16 = arith.constant 0 : index
    %20 = vector.load %arg7[%c0_15, %c0_16] : memref<1x128xf32, #tpu.memory_space<vmem>>, vector<1x128xf32>
    %21 = vector.broadcast %20 : vector<1x128xf32> to vector<128x128xf32>
    %22 = arith.addf %19, %21 : vector<128x128xf32>
    %c0_17 = arith.constant 0 : index
    %c0_18 = arith.constant 0 : index
    %23 = vector.load %arg8[%c0_17, %c0_18] : memref<128x128xf32, #tpu.memory_space<vmem>>, vector<128x128xf32>
    tpu.vector_store %arg8[%c0_17, %c0_18], %22 {strides = array<i32>} : memref<128x128xf32, #tpu.memory_space<vmem>>, vector<128x128xf32>,
    return
  }
  func.func @transform_0(%arg0: i32) -> (i32, i32) {
    %c0_i32 = arith.constant 0 : i32
    %c0_i32_0 = arith.constant 0 : i32
    return %arg0, %c0_i32 : i32, i32
  }
  func.func @transform_1(%arg0: i32) -> (i32, i32) {
    %c0_i32 = arith.constant 0 : i32
    %c0_i32_0 = arith.constant 0 : i32
    %c0_i32_1 = arith.constant 0 : i32
    return %c0_i32, %c0_i32_0 : i32, i32
  }
  func.func @transform_2(%arg0: i32) -> (i32, i32) {
    %c0_i32 = arith.constant 0 : i32
    %c0_i32_0 = arith.constant 0 : i32
    %c0_i32_1 = arith.constant 0 : i32
    return %c0_i32, %c0_i32_0 : i32, i32
  }
  func.func @transform_3(%arg0: i32) -> (i32, i32) {
    %c0_i32 = arith.constant 0 : i32
    %c0_i32_0 = arith.constant 0 : i32
    %c0_i32_1 = arith.constant 0 : i32
    return %c0_i32, %c0_i32_0 : i32, i32
  }
  func.func @transform_4(%arg0: i32) -> (i32, i32) {
    %c0_i32 = arith.constant 0 : i32
    %c0_i32_0 = arith.constant 0 : i32
    %c0_i32_1 = arith.constant 0 : i32
    return %c0_i32, %c0_i32_0 : i32, i32
  }
  func.func @transform_5(%arg0: i32) -> (i32, i32) {
    %c0_i32 = arith.constant 0 : i32
    %c0_i32_0 = arith.constant 0 : i32
    %c0_i32_1 = arith.constant 0 : i32
    return %c0_i32, %c0_i32_0 : i32, i32
  }
  func.func @transform_6(%arg0: i32) -> (i32, i32) {
    %c0_i32 = arith.constant 0 : i32
    %c0_i32_0 = arith.constant 0 : i32
    %c0_i32_1 = arith.constant 0 : i32
    return %c0_i32, %c0_i32_0 : i32, i32
  }
  func.func @transform_7(%arg0: i32) -> (i32, i32) {
    %c0_i32 = arith.constant 0 : i32
    %c0_i32_0 = arith.constant 0 : i32
    return %arg0, %c0_i32 : i32, i32
  }
}

</mosaic_0001>

<bundles_post_ra>
// kernel: dnn_forward.1
= control target key start
LH: loop header
LB: loop body
LE: loop exit
PB: predicated region body
PF: predicated region fallthrough
CT: control target
= control target key end

     0   :  { %s3973_s0 = inlined_call_operand.hbm [shape: f32[200,784], index: 0, kind: input, shape index: {}]   ;;  %s3974_s1 = inlined_call_operand.hbm [shape: bf16[784,256], index: 1, kind: input, shape index: {}]   ;;  %s3975_s2 = inlined_call_operand.vmem [shape: f32[1,256], index: 2, kind: input, shape index: {}]   ;;  %s3976_s3 = inlined_call_operand.hbm [shape: bf16[256,128], index: 3, kind: input, shape index: {}]   ;;  %s3977_s4 = inlined_call_operand.vmem [shape: f32[1,128], index: 4, kind: input, shape index: {}]   ;;  %s3978_s5 = inlined_call_operand.hbm [shape: bf16[128,128], index: 5, kind: input, shape index: {}]   ;;  %s3979_s6 = inlined_call_operand.vmem [shape: f32[1,128], index: 6, kind: input, shape index: {}]   ;;  %s3980_s7 = inlined_call_operand.vmem [shape: f32[200,128], index: 7, kind: output, shape index: {}]  }
   0x1   :  { %3986 = sst [smem:[#allocation15_spill]] %s3974_s1 }
   0x2   :  { %12 = vsyncpa [#allocation3], 0 }
   0x3   :  { %14 = vsyncpa [#allocation3 + $0x1], 0 }
   0x4   :  { %15 = vsyncpa [#allocation5], 0 }
   0x5   :  { %16 = vsyncpa [#allocation8], 0  ;;  %s3395_s24 = smov 0   ;;  %s3397_s25 = smov 0  }
   0x6   :  { %s3399_s26 = smov 0   ;;  %s3401_s27 = smov 0  }
   0x7 LB: > { %s3414_s28 = sadd.s32 4294967295, %s3310_s27   ;;  %s3417_s29 = sadd.s32 1, %s3310_s27   ;;  %s3310_s27 = sphi %s3401_s27, %s4007_s27   ;;  %s3306_s26 = sphi %s3399_s26, %s4011_s26   ;;  %s3302_s25 = sphi %s3397_s25, %s4010_s25   ;;  %s3298_s24 = sphi %s3395_s24, %s4009_s24  }
   0x8   : > { %3987 = sst [smem:[#allocation13_spill]] %s3417_s29  ;;  %s26_s30 = ssub.s32 %s3310_s27, %s3417_s29 }
   0x9   : > { %s29_s8 = sadd.s32 1, %s3306_s26  ;;  %p27_p0 = scmp.eq.s32.totalorder %s26_s30, 0 }
   0xa   : > { %p36_p1 = scmp.ne.s32.totalorder %s3306_s26, %s3302_s25  ;;  %p37_p2 = scmp.eq.s32.totalorder %s3310_s27, 0 }
   0xb   : > { %p42_p3 = scmp.ne.s32.totalorder %s3302_s25, %s3298_s24  ;;  %p3981_p5 = scmp.eq.s32.totalorder %s3414_s28, 0 }
   0xc   : > { %s3427_s9 = scalar_select %p27_p0, %s3306_s26, %s29_s8  }
   0xd   : > { %p3429_p4 = por %p37_p2, %p36_p1  ;;  %p192_p6 = scmp.eq.s32.totalorder %s3414_s28, 1 }
   0xe   : > { %3988 = sst [smem:[#allocation14_spill]] %s3427_s9  ;;  %p2406_p7 = scmp.ge.s32.totalorder %s3310_s27, 1 }
   0xf   : > { %s3989_s10 = scalar_select %p3429_p4, 1, 0 }
  0x10   : > { %p3438_p8 = por %p3981_p5, %p42_p3  ;;  %p205_p9 = scmp.lt.s32.totalorder %s3310_s27, 3 }
  0x11   : > { %p3443_p10 = por %p192_p6, %p36_p1  ;;  %s3344_s14 = smov [#allocation4]  }
  0x12   : > { %s3990_s11 = scalar_select %p3438_p8, 1, 0 }
  0x13   : > { %s3991_s12 = scalar_select %p3443_p10, 1, 0 }
  0x14   : > { %p3447_p11 = pnand %p2406_p7, %p205_p9  ;;  %s217_s15 = sshll.u32 %s3344_s14, 4  ;;  %s218_s15 = int_to_ptr.vmem [resolvable:$true] %s217_s15 }
  0x15   : > { %s3345_s17 = smov [#allocation6]   ;;  %s3994_s1 = sld [smem:[#allocation15_spill]] }
  0x16   : > { %s3992_s13 = scalar_select %p3447_p11, 1, 0 }
  0x17   : > { %p2831_p12 = pneg %p3447_p11  ;;  %s233_s18 = sshll.u32 %s3345_s17, 4  ;;  %s3459_s18 = int_to_ptr.vmem [resolvable:$true] %s233_s18 }
  0x19   : > { %p3455_p13 = pnand %p2831_p12, %p3981_p5 }
  0x1b   : > { %s3124_s21 = scalar_lea.hbm %s3994_s1, 12544  ;;  %p3469_p1 = pneg %p3455_p13 }
  0x1c   : > { %p3125_p0 = scmp.ne.s32.totalorder %s3994_s1, %s3124_s21  ;;  %p3131_p6 = scmp.lt.u32.totalorder %s3124_s21, %s3994_s1 }
  0x1e   : > { %p3127_p2 = pnand %p3469_p1, %p3125_p0 }
  0x20   : > { %p3128_p3 = pneg %p3127_p2 }
  0x22   : > { %p3133_p7 = pnand %p3131_p6, %p3128_p3 }
  0x24   : > { %3136 = shalt.err (!%p3133_p7)
}
  0x25   : > { %s3137_s14 = scalar_lea.vmem %s218_s15, 12544  ;;  %p3145_p10 = scmp.lt.s32.totalorder %s218_s15, %s218_s15 }
  0x26   : > { %p3138_p9 = scmp.ne.s32.totalorder %s218_s15, %s3137_s14  ;;  %p3146_p8 = scmp.lt.s32.totalorder %s3137_s14, %s3137_s14 }
  0x28   : > { %p3140_p12 = pnand %p3138_p9, %p3469_p1  ;;  %p3147_p11 = por %p3146_p8, %p3145_p10 }
  0x2a   : > { %p3141_p5 = pneg %p3140_p12 }
  0x2c   : > { %p3148_p4 = pnand %p3147_p11, %p3141_p5 }
  0x2e   : > { %3151 = shalt.err (!%p3148_p4)
}
  0x2f   : > { %s3346_s17 = smov 128   ;;  %s3347_s19 = smov 8  }
  0x30   : > { %2834 = dma.hbm_to_vmem [thread:$0]  (!%p3455_p13), %s3994_s1, 12544, %s218_s15, [#allocation5], %s3346_s17, %s3346_s17, %s3347_s19  }
  0x31   : > { %s3152_s30 = scalar_lea.hbm %s3976_s3, 2048 }
  0x32   : > { %p3153_p0 = scmp.ne.s32.totalorder %s3976_s3, %s3152_s30  ;;  %p3159_p8 = scmp.lt.u32.totalorder %s3152_s30, %s3976_s3 }
  0x34   : > { %p3155_p5 = pnand %p3153_p0, %p3469_p1 }
  0x36   : > { %p3156_p4 = pneg %p3155_p5 }
  0x38   : > { %p3161_p10 = pnand %p3159_p8, %p3156_p4 }
  0x3a   : > { %3164 = shalt.err (!%p3161_p10)
}
  0x3b   : > { %s3165_s15 = scalar_lea.vmem %s3459_s18, 2048  ;;  %p3173_p6 = scmp.lt.s32.totalorder %s3459_s18, %s3459_s18 }
  0x3c   : > { %p3166_p11 = scmp.ne.s32.totalorder %s3459_s18, %s3165_s15  ;;  %p3174_p7 = scmp.lt.s32.totalorder %s3165_s15, %s3165_s15 }
  0x3e   : > { %p3168_p2 = pnand %p3166_p11, %p3469_p1  ;;  %p3175_p9 = por %p3174_p7, %p3173_p6 }
  0x40   : > { %p3169_p3 = pneg %p3168_p2 }
  0x42   : > { %p3176_p12 = pnand %p3175_p9, %p3169_p3 }
  0x44   : > { %3179 = shalt.err (!%p3176_p12)
}
  0x45   : > { %s3348_s9 = smov 64   ;;  %s3349_s29 = smov 4  }
  0x46   : > { %2837 = dma.hbm_to_vmem [thread:$0]  (!%p3455_p13), %s3976_s3, 2048, %s3459_s18, [#allocation5], %s3348_s9, %s3348_s9, %s3349_s29  }
  0x47   : > { %s3350_s20 = smov [#allocation7]   ;;  %s3180_s30 = scalar_lea.hbm %s3978_s5, 1024 }
  0x48   : > { %s249_s21 = sshll.u32 %s3350_s20, 4  ;;  %p3181_p0 = scmp.ne.s32.totalorder %s3978_s5, %s3180_s30  ;;  %s250_s21 = int_to_ptr.vmem [resolvable:$true] %s249_s21 }
  0x49   : > { %p3187_p8 = scmp.lt.u32.totalorder %s3180_s30, %s3978_s5 }
  0x4a   : > { %p3183_p5 = pnand %p3181_p0, %p3469_p1 }
  0x4c   : > { %p3184_p4 = pneg %p3183_p5 }
  0x4e   : > { %p3189_p10 = pnand %p3187_p8, %p3184_p4 }
  0x50   : > { %3192 = shalt.err (!%p3189_p10)
}
  0x51   : > { %s3193_s18 = scalar_lea.vmem %s250_s21, 1024  ;;  %p3201_p6 = scmp.lt.s32.totalorder %s250_s21, %s250_s21 }
  0x52   : > { %p3194_p11 = scmp.ne.s32.totalorder %s250_s21, %s3193_s18  ;;  %p3202_p7 = scmp.lt.s32.totalorder %s3193_s18, %s3193_s18 }
  0x54   : > { %p3196_p2 = pnand %p3194_p11, %p3469_p1  ;;  %p3203_p9 = por %p3202_p7, %p3201_p6 }
  0x56   : > { %p3197_p3 = pneg %p3196_p2 }
  0x58   : > { %p3204_p12 = pnand %p3203_p9, %p3197_p3 }
  0x5a   : > { %3207 = shalt.err (!%p3204_p12)
}
  0x5b   : > { %2840 = dma.hbm_to_vmem [thread:$0]  (!%p3455_p13), %s3978_s5, 1024, %s250_s21, [#allocation8], %s3348_s9, %s3348_s9, %s3349_s29  }
  0x5c   : > { %p2410_p0 = scmp.ge.s32.totalorder %s3310_s27, 2 }
  0x5d   : > { %p3996_p5 = scmp.ne.s32.totalorder (!%p2410_p0), %s3989_s10, 0 }
  0x5e   : > { %262 = sbr.rel (%p2410_p0) target bundleno = 137 (0x89), region = 40 }
  0x65   : > { %265 = sbr.rel (!%p3996_p5) target bundleno = 137 (0x89), region = 44  ;;  %s266_s1 = sand.u32 (%p3996_p5), 1, %s3306_s26  }
  0x66   : > { %s2411_s24 = sshll.u32 (%p3996_p5), %s3310_s27, 4  ;;  %s2815_s20 = smul.u32 (%p3996_p5), 896, %s266_s1 }
  0x67   : > { %s272_s22 = ssub.s32 (%p3996_p5), 25, %s2411_s24  ;;  %s3534_s30 = scalar_lea.sflag (%p3996_p5), [#allocation3], %s266_s1 }
  0x68   : > { %p273_p1 = scmp.lt.s32.totalorder (%p3996_p5), %s272_s22, 16  ;;  %s270_s9 = scalar_lea.vmem (%p3996_p5), [#allocation2], %s2815_s20 }
  0x6c   : > { %s4013_s22 = smov (!%p273_p1, %s272_s22), 16 }
  0x6d   : > { %s3531_s23 = smul.u32 896, %s4013_s22 }
  0x6f   : > { %s278_s16 = ssub.s32 14336, %s3531_s23 }
  0x70   : > { %279 = vsyncadd %s3534_s30, %s278_s16  ;;  %p2414_p13 = scmp.ne.s32.totalorder %s3531_s23, 0  ;;  %s2816_s10 = smul.u32 14336, %s3310_s27 }
  0x71   : > { %s285_s29 = sshll.u32 %s270_s9, 4  ;;  %s3212_s27 = scalar_lea.hbm %s3973_s0, 22400  ;;  %s3544_s29 = int_to_ptr.vmem [resolvable:$true] %s285_s29 }
  0x72   : > { %s3542_s14 = scalar_lea.hbm %s3973_s0, %s2816_s10 }
  0x73   : > { %s3208_s15 = scalar_lea.hbm %s3542_s14, %s3531_s23  ;;  %p3213_p11 = scmp.lt.u32.totalorder %s3542_s14, %s3973_s0 }
  0x74   : > { %p3209_p4 = scmp.ne.s32.totalorder %s3542_s14, %s3208_s15  ;;  %p3214_p2 = scmp.lt.u32.totalorder %s3212_s27, %s3208_s15 }
  0x75   : > { %p3216_p6 = scmp.lt.u32.totalorder %s3208_s15, %s3542_s14 }
  0x76   : > { %p3210_p8 = pnand %p3209_p4, %p2414_p13  ;;  %p3215_p3 = por %p3214_p2, %p3213_p11 }
  0x78   : > { %p3211_p10 = pneg %p3210_p8  ;;  %p3217_p7 = por %p3216_p6, %p3215_p3 }
  0x7a   : > { %p3218_p9 = pnand %p3217_p7, %p3211_p10 }
  0x7c   : > { %3221 = shalt.err (!%p3218_p9)
}
  0x7d   : > { %s3222_s24 = scalar_lea.vmem %s3544_s29, %s3531_s23  ;;  %s3351_s20 = smov [#allocation2]  }
  0x7e   : > { %p3223_p12 = scmp.ne.s32.totalorder %s3544_s29, %s3222_s24  ;;  %s3226_s22 = sshll.u32 %s3351_s20, 4  ;;  %s3227_s22 = int_to_ptr.vmem [resolvable:$false] %s3226_s22 }
  0x7f   : > { %s3228_s16 = scalar_lea.vmem %s3227_s22, 28672  ;;  %p3229_p1 = scmp.lt.s32.totalorder %s3544_s29, %s3227_s22 }
  0x80   : > { %p3224_p0 = pnand %p3223_p12, %p2414_p13  ;;  %p3230_p4 = scmp.lt.s32.totalorder %s3228_s16, %s3222_s24 }
  0x82   : > { %p3225_p5 = pneg %p3224_p0  ;;  %p3231_p8 = por %p3230_p4, %p3229_p1 }
  0x84   : > { %p3232_p11 = pnand %p3231_p8, %p3225_p5 }
  0x86   : > { %3235 = shalt.err (!%p3232_p11)
}
  0x87   : > { %s3352_s9 = smov 896   ;;  %s3353_s10 = smov 56  }
  0x88   : > { %291 = dma.hbm_to_vmem [thread:$0]  (%p2414_p13), %s3542_s14, %s3531_s23, %s3544_s29, %s3534_s30, %s3352_s9, %s3352_s9, %s3353_s10  }
  0x89 PF: > { %p3997_p10 = scmp.ne.s32.totalorder %s3992_s13, 0 }
  0x8a   : > { %s3574_s21 = sand.u32 (!%p3997_p10), 1, %s3302_s25   ;;  %p3998_p2 = scmp.ne.s32.totalorder (!%p3997_p10), %s3990_s11, 0 }
  0x8b   : > { %297 = sbr.rel (%p3997_p10) target bundleno = 1115 (0x45b), region = 48  ;;  %s300_s15 = scalar_lea.sflag (!%p3997_p10), [#allocation3], %s3574_s21 }
  0x8c   : > { %s2817_s8 = smul.u32 (!%p3997_p10), 896, %s3574_s21 }
  0x8e   : > { %s3578_s18 = scalar_lea.vmem (!%p3997_p10), [#allocation2], %s2817_s8 }
  0x92   : > { %3285 = dma.done.wait (%p3998_p2), %s300_s15, 14336  }
  0x93   : > { %3287 = vsyncadd (%p3998_p2), %s300_s15, 4294952960  ;;  %p3999_p13 = scmp.eq.s32.totalorder %s3414_s28, 0 }
  0x95   : > { %3289 = dma.done.wait (%p3999_p13), [#allocation5], 14592   ;;  %p4000_p3 = pmov %p3999_p13 }
  0x97   : > { %3291 = vsyncadd (%p4000_p3), [#allocation5], 4294952704  ;;  %p4001_p6 = pmov %p4000_p3 }
  0x98   : > { %p4002_p7 = pmov %p4000_p3 }
  0x99   : > { %3293 = dma.done.wait (%p4001_p6), [#allocation8], 1024  }
  0x9a   : > { %3295 = vsyncadd (%p4002_p7), [#allocation8], 4294966272  ;;  %v2953_v0 = vld [vmem:[#allocation4 + $0x104] ss:$8 sps:$4 sm:$0xff]   ;;  %v2955_v1 = vld [vmem:[#allocation4 + $0x100] ss:$8 sps:$4 sm:$0xff]  }
  0x9b   : > { %1263 = vmatprep.subr.bf16.mxu0 %v2953_v0  ;;  %v2956_v2 = vld [vmem:[#allocation4 + $0x114] ss:$8 sps:$4 sm:$0xff]   ;;  %v2958_v3 = vld [vmem:[#allocation4 + $0x110] ss:$8 sps:$4 sm:$0xff]   ;;  %v2959_v4 = vld [vmem:[#allocation4 + $0x124] ss:$8 sps:$4 sm:$0xff]  }
  0x9c   : > { %1264 = vmatpush1.bf16.msra.mxu0 %v2955_v1  ;;  %v2961_v5 = vld [vmem:[#allocation4 + $0x120] ss:$8 sps:$4 sm:$0xff]   ;;  %v2962_v6 = vld [vmem:[#allocation4 + $0x134] ss:$8 sps:$4 sm:$0xff]   ;;  %v2964_v7 = vld [vmem:[#allocation4 + $0x130] ss:$8 sps:$4 sm:$0xff]  }
  0x9d   : > { %1265 = vmatprep.subr.bf16.mxu0 %v2956_v2  ;;  %v2965_v8 = vld [vmem:[#allocation4 + $0x144] ss:$8 sps:$4 sm:$0xff]   ;;  %v2967_v9 = vld [vmem:[#allocation4 + $0x140] ss:$8 sps:$4 sm:$0xff]   ;;  %v2968_v10 = vld [vmem:[#allocation4 + $0x154] ss:$8 sps:$4 sm:$0xff]  }
  0x9e   : > { %v2970_v11 = vld [vmem:[#allocation4 + $0x150] ss:$8 sps:$4 sm:$0xff]   ;;  %v2971_v12 = vld [vmem:[#allocation4 + $0x164] ss:$8 sps:$4 sm:$0xff]   ;;  %v2973_v16 = vld [vmem:[#allocation4 + $0x160] ss:$8 sps:$4 sm:$0xff]  }
  0x9f   : > { %v360_v13 = vld [vmem:[%s3578_s18 + $0x18] sm:$0xff]  ;;  %v367_v14 = vld [vmem:[%s3578_s18 + $0x50] sm:$0xff]  ;;  %v2977_v19 = vld [vmem:[#allocation4 + $0x184] ss:$8 sps:$4 sm:$0xff]   ;;  %vm1125_vm0 = vcmask 130048   ;;  %s2422_s29 = sshll.u32 %s3574_s21, 7 }
  0xa0   : > { %1266 = vmatpush1.bf16.msra.mxu0 %v2958_v3  ;;  %v472_v15 = vpack.c.bf16 %v367_v14, %v360_v13  ;;  %v2974_v17 = vld [vmem:[#allocation4 + $0x174] ss:$8 sps:$4 sm:$0xff]   ;;  %v2976_v18 = vld [vmem:[#allocation4 + $0x170] ss:$8 sps:$4 sm:$0xff]   ;;  %v2979_v20 = vld [vmem:[#allocation4 + $0x180] ss:$8 sps:$4 sm:$0xff]  }
  0xa1   : > { %1267 = vmatprep.subr.bf16.mxu0 %v2959_v4  ;;  %v2980_v21 = vld [vmem:[#allocation4 + $0x194] ss:$8 sps:$4 sm:$0xff]   ;;  %v2982_v22 = vld [vmem:[#allocation4 + $0x190] ss:$8 sps:$4 sm:$0xff]   ;;  %v2983_v23 = vld [vmem:[#allocation4 + $0x1a4] ss:$8 sps:$4 sm:$0xff]  }
  0xa2   : > { %1295 = vmatprep.mubr.bf16.mxu0 %v472_v15  ;;  %v2985_v24 = vld [vmem:[#allocation4 + $0x1a0] ss:$8 sps:$4 sm:$0xff]   ;;  %v2986_v25 = vld [vmem:[#allocation4 + $0x1b4] ss:$8 sps:$4 sm:$0xff]   ;;  %v2988_v26 = vld [vmem:[#allocation4 + $0x1b0] ss:$8 sps:$4 sm:$0xff]  }
  0xa3   : > { %v2989_v27 = vld [vmem:[#allocation4 + $0x1c4] ss:$8 sps:$4 sm:$0xff]   ;;  %v2991_v28 = vld [vmem:[#allocation4 + $0x1c0] ss:$8 sps:$4 sm:$0xff]   ;;  %v2992_v29 = vld [vmem:[#allocation4 + $0x1d4] ss:$8 sps:$4 sm:$0xff]  }
  0xa4   : > { %1268 = vmatpush1.bf16.msra.mxu0 %v2961_v5  ;;  %v2994_v30 = vld [vmem:[#allocation4 + $0x1d0] ss:$8 sps:$4 sm:$0xff]   ;;  %v2995_v31 = vld [vmem:[#allocation4 + $0x1e4] ss:$8 sps:$4 sm:$0xff]   ;;  %v3051_v33 = vld [vmem:[#allocation4] ss:$8 sps:$4 sm:$0xff]  }
  0xa5   : > { %1269 = vmatprep.subr.bf16.mxu0 %v2962_v6  ;;  %v3046_v32 = vld [vmem:[#allocation4 + $0x4] ss:$8 sps:$4 sm:$0xff]   ;;  %v2997_v34 = vld [vmem:[#allocation4 + $0x1e0] ss:$8 sps:$4 sm:$0xff]   ;;  %v2998_v35 = vld [vmem:[#allocation4 + $0x1f4] ss:$8 sps:$4 sm:$0xff]  }
  0xa6   : > { %1150 = vmatprep.subr.bf16.mxu1 %v3046_v32  ;;  %v3052_v36 = vld [vmem:[#allocation4 + $0x14] ss:$8 sps:$4 sm:$0xff]   ;;  %v3000_v37 = vld [vmem:[#allocation4 + $0x1f0] ss:$8 sps:$4 sm:$0xff]   ;;  %v366_v39 = vld [vmem:[%s3578_s18 + $0x48] sm:$0xff]  ;;  %s3852_s27 = scalar_lea.vmem [#allocation9], %s2422_s29  }
  0xa7   : > { %1151 = vmatpush1.bf16.msra.mxu1 %v3051_v33  ;;  %v359_v38 = vld [vmem:[%s3578_s18 + $0x10] sm:$0xff]  ;;  %v3003_v40 = vld [vmem:[#allocation4 + $0x204] ss:$8 sps:$4 sm:$0xff]   ;;  %v3060_v45 = vld [vmem:[#allocation4 + $0x20] ss:$8 sps:$4 sm:$0xff]   ;;  %p4003_p9 = scmp.ne.s32.totalorder %s3991_s12, 0 }
  0xa8   : > { %1270 = vmatpush1.bf16.msra.mxu0 %v2964_v7  ;;  %1152 = vmatprep.subr.bf16.mxu1 %v3052_v36  ;;  %v3057_v41 = vld [vmem:[#allocation4 + $0x10] ss:$8 sps:$4 sm:$0xff]   ;;  %v374_v42 = vld [vmem:[%s3578_s18 + $0x88] sm:$0xff]  ;;  %v381_v44 = vld [vmem:[%s3578_s18 + $0xc0] sm:$0xff]  ;;  %v471_v47 = vpack.c.bf16 %v366_v39, %v359_v38  ;;  %s2556_s19 = sshll.u32 (%p4003_p9), %s3414_s28, 4  ;;  %s2572_s1 = sshll.u32 (%p4003_p9), %s3414_s28, 7 }
  0xa9   : > { %1271 = vmatprep.subr.bf16.mxu0 %v2965_v8  ;;  %v3058_v43 = vld [vmem:[#allocation4 + $0x24] ss:$8 sps:$4 sm:$0xff]   ;;  %v3061_v46 = vld [vmem:[#allocation4 + $0x34] ss:$8 sps:$4 sm:$0xff]   ;;  %v3001_v48 = vld [vmem:[#allocation4 + $0x200] ss:$8 sps:$4 sm:$0xff]   ;;  %v479_v49 = vpack.c.bf16 %v381_v44, %v374_v42  ;;  %s3877_s16 = scalar_lea.vmem (%p4003_p9), %s3980_s7, %s2572_s1  }
  0xaa   : > { %v3006_v50 = vld [vmem:[#allocation4 + $0x214] ss:$8 sps:$4 sm:$0xff]   ;;  %v3063_v51 = vld [vmem:[#allocation4 + $0x30] ss:$8 sps:$4 sm:$0xff]   ;;  %v3064_v53 = vld [vmem:[#allocation4 + $0x44] ss:$8 sps:$4 sm:$0xff]  }
  0xab   : > { %1153 = vmatpush1.bf16.msra.mxu1 %v3057_v41  ;;  %v3004_v52 = vld [vmem:[#allocation4 + $0x210] ss:$8 sps:$4 sm:$0xff]   ;;  %v373_v54 = vld [vmem:[%s3578_s18 + $0x80] sm:$0xff]  ;;  %v3067_v60 = vld [vmem:[#allocation4 + $0x54] ss:$8 sps:$4 sm:$0xff]   ;;  %s2098_s24 = ssub.s32 (%p4003_p9), 25, %s2556_s19 }
  0xac   : > { %1272 = vmatpush1.bf16.msra.mxu0 %v2967_v9  ;;  %1154 = vmatprep.subr.bf16.mxu1 %v3058_v43  ;;  %v380_v55 = vld [vmem:[%s3578_s18 + $0xb8] sm:$0xff]  ;;  %v3009_v56 = vld [vmem:[#allocation4 + $0x224] ss:$8 sps:$4 sm:$0xff]   ;;  %v395_v58 = vld [vmem:[%s3578_s18 + $0x130] sm:$0xff]  ;;  %p2099_p12 = scmp.lt.s32.totalorder (%p4003_p9), %s2098_s24, 16 }
  0xad   : > { %1273 = vmatprep.subr.bf16.mxu0 %v2968_v10  ;;  %v388_v57 = vld [vmem:[%s3578_s18 + $0xf8] sm:$0xff]  ;;  %v3066_v59 = vld [vmem:[#allocation4 + $0x40] ss:$8 sps:$4 sm:$0xff]   ;;  %v478_v61 = vpack.c.bf16 %v380_v55, %v373_v54  ;;  %v3070_v3 = vld [vmem:[#allocation4 + $0x64] ss:$8 sps:$4 sm:$0xff]  }
  0xae   : > { %v3007_v62 = vld [vmem:[#allocation4 + $0x220] ss:$8 sps:$4 sm:$0xff]   ;;  %v486_v63 = vpack.c.bf16 %v395_v58, %v388_v57  ;;  %v3012_v0 = vld [vmem:[#allocation4 + $0x234] ss:$8 sps:$4 sm:$0xff]   ;;  %v3069_v1 = vld [vmem:[#allocation4 + $0x50] ss:$8 sps:$4 sm:$0xff]  }
  0xaf   : > { %1155 = vmatpush1.bf16.msra.mxu1 %v3060_v45  ;;  %v3010_v2 = vld [vmem:[#allocation4 + $0x230] ss:$8 sps:$4 sm:$0xff]   ;;  %v394_v5 = vld [vmem:[%s3578_s18 + $0x128] sm:$0xff]  ;;  %v409_v8 = vld [vmem:[%s3578_s18 + $0x1a0] sm:$0xff] }
  0xb0   : > { %1274 = vmatpush1.bf16.msra.mxu0 %v2970_v11  ;;  %1156 = vmatprep.subr.bf16.mxu1 %v3061_v46  ;;  %v387_v4 = vld [vmem:[%s3578_s18 + $0xf0] sm:$0xff]  ;;  %v3015_v6 = vld [vmem:[#allocation4 + $0x244] ss:$8 sps:$4 sm:$0xff]   ;;  %v3072_v9 = vld [vmem:[#allocation4 + $0x60] ss:$8 sps:$4 sm:$0xff]  }
  0xb1   : > { %1275 = vmatprep.subr.bf16.mxu0 %v2971_v12  ;;  %v402_v7 = vld [vmem:[%s3578_s18 + $0x168] sm:$0xff]  ;;  %v3073_v10 = vld [vmem:[#allocation4 + $0x74] ss:$8 sps:$4 sm:$0xff]   ;;  %v485_v11 = vpack.c.bf16 %v394_v5, %v387_v4  ;;  %v3075_v15 = vld [vmem:[#allocation4 + $0x70] ss:$8 sps:$4 sm:$0xff]  }
  0xb2   : > { %v3013_v12 = vld [vmem:[#allocation4 + $0x240] ss:$8 sps:$4 sm:$0xff]   ;;  %v493_v13 = vpack.c.bf16 %v409_v8, %v402_v7  ;;  %v3018_v14 = vld [vmem:[#allocation4 + $0x254] ss:$8 sps:$4 sm:$0xff]   ;;  %v3082_v33 = vld [vmem:[#allocation4 + $0xa4] ss:$8 sps:$4 sm:$0xff]  }
  0xb3   : > { %1157 = vmatpush1.bf16.msra.mxu1 %v3063_v51  ;;  %v422_v36 = vld [vmem:[%s3578_s18 + $0x208] sm:$0xff]  ;;  %v437_v39 = vld [vmem:[%s3578_s18 + $0x280] sm:$0xff]  ;;  %v3085_v41 = vld [vmem:[#allocation4 + $0xb4] ss:$8 sps:$4 sm:$0xff]  }
  0xb4   : > { %1276 = vmatpush1.bf16.msra.mxu0 %v2973_v16  ;;  %1158 = vmatprep.subr.bf16.mxu1 %v3064_v53  ;;  %v3016_v16 = vld [vmem:[#allocation4 + $0x250] ss:$8 sps:$4 sm:$0xff]   ;;  %v430_v38 = vld [vmem:[%s3578_s18 + $0x248] sm:$0xff]  ;;  %v3030_v45 = vld [vmem:[#allocation4 + $0x294] ss:$8 sps:$4 sm:$0xff]  }
  0xb5   : > { %1277 = vmatprep.subr.bf16.mxu0 %v2974_v17  ;;  %v3076_v17 = vld [vmem:[#allocation4 + $0x84] ss:$8 sps:$4 sm:$0xff]   ;;  %v3025_v43 = vld [vmem:[#allocation4 + $0x280] ss:$8 sps:$4 sm:$0xff]   ;;  %v507_v44 = vpack.c.bf16 %v437_v39, %v430_v38  ;;  %v3087_v46 = vld [vmem:[#allocation4 + $0xb0] ss:$8 sps:$4 sm:$0xff]  }
  0xb6   : > { %v3033_v51 = vld [vmem:[#allocation4 + $0x2a4] ss:$8 sps:$4 sm:$0xff]   ;;  %v451_v53 = vld [vmem:[%s3578_s18 + $0x2f0] sm:$0xff]  ;;  %v3090_v54 = vld [vmem:[#allocation4 + $0xc0] ss:$8 sps:$4 sm:$0xff]  }
  0xb7   : > { %1159 = vmatpush1.bf16.msra.mxu1 %v3066_v59  ;;  %v3091_v55 = vld [vmem:[#allocation4 + $0xd4] ss:$8 sps:$4 sm:$0xff]   ;;  %v3093_v59 = vld [vmem:[#allocation4 + $0xd0] ss:$8 sps:$4 sm:$0xff]   ;;  %v3096_v4 = vld [vmem:[#allocation4 + $0xe0] ss:$8 sps:$4 sm:$0xff]  }
  0xb8   : > { %1278 = vmatpush1.bf16.msra.mxu0 %v2976_v18  ;;  %1160 = vmatprep.subr.bf16.mxu1 %v3067_v60  ;;  %v401_v18 = vld [vmem:[%s3578_s18 + $0x160] sm:$0xff]  ;;  %v3036_v58 = vld [vmem:[#allocation4 + $0x2b4] ss:$8 sps:$4 sm:$0xff]  }
  0xb9   : > { %1279 = vmatprep.subr.bf16.mxu0 %v2977_v19  ;;  %v408_v19 = vld [vmem:[%s3578_s18 + $0x198] sm:$0xff]  ;;  %v3056_v38 = vld [vmem:[#allocation4 + $0x304] ss:$8 sps:$4 sm:$0xff]  }
  0xba   : > { %v3097_v5 = vld [vmem:[#allocation4 + $0xf4] ss:$8 sps:$4 sm:$0xff]  }
  0xbb   : > { %1161 = vmatpush1.bf16.msra.mxu1 %v3069_v1  ;;  %v3039_v1 = vld [vmem:[#allocation4 + $0x2c4] ss:$8 sps:$4 sm:$0xff]   ;;  %v3042_v8 = vld [vmem:[#allocation4 + $0x2d4] ss:$8 sps:$4 sm:$0xff]  }
  0xbc   : > { %1280 = vmatpush1.bf16.msra.mxu0 %v2979_v20  ;;  %1162 = vmatprep.subr.bf16.mxu1 %v3070_v3  ;;  %v3021_v20 = vld [vmem:[#allocation4 + $0x264] ss:$8 sps:$4 sm:$0xff]   ;;  %v376_v39 = vld [vmem:[%s3578_s18 + $0x98] sm:$0xff] }
  0xbd   : > { %1281 = vmatprep.subr.bf16.mxu0 %v2980_v21  ;;  %v416_v21 = vld [vmem:[%s3578_s18 + $0x1d8] sm:$0xff]  ;;  %v465_v3 = vld [vmem:[%s3578_s18 + $0x360] sm:$0xff] }
  0xbf   : > { %1163 = vmatpush1.bf16.msra.mxu1 %v3072_v9  ;;  %v3099_v9 = vld [vmem:[#allocation4 + $0xf0] ss:$8 sps:$4 sm:$0xff]  }
  0xc0   : > { %1282 = vmatpush1.bf16.msra.mxu0 %v2982_v22  ;;  %1164 = vmatprep.subr.bf16.mxu1 %v3073_v10  ;;  %v423_v22 = vld [vmem:[%s3578_s18 + $0x210] sm:$0xff]  ;;  %v357_v10 = vld [vmem:[%s3578_s18] sm:$0xff] }
  0xc1   : > { %1283 = vmatprep.subr.bf16.mxu0 %v2983_v23  ;;  %v3078_v23 = vld [vmem:[#allocation4 + $0x80] ss:$8 sps:$4 sm:$0xff]  }
  0xc3   : > { %1165 = vmatpush1.bf16.msra.mxu1 %v3075_v15  ;;  %v372_v15 = vld [vmem:[%s3578_s18 + $0x78] sm:$0xff] }
  0xc4   : > { %1284 = vmatpush1.bf16.msra.mxu0 %v2985_v24  ;;  %1166 = vmatprep.subr.bf16.mxu1 %v3076_v17  ;;  %v3079_v24 = vld [vmem:[#allocation4 + $0x94] ss:$8 sps:$4 sm:$0xff]  }
  0xc5   : > { %1285 = vmatprep.subr.bf16.mxu0 %v2986_v25  ;;  %v492_v25 = vpack.c.bf16 %v408_v19, %v401_v18  ;;  %v464_v17 = vld [vmem:[%s3578_s18 + $0x358] sm:$0xff]  ;;  %v3045_v18 = vld [vmem:[#allocation4 + $0x2e4] ss:$8 sps:$4 sm:$0xff]  }
  0xc6   : > { %v362_v19 = vld [vmem:[%s3578_s18 + $0x28] sm:$0xff] }
  0xc7   : > { %1167 = vmatpush1.bf16.msra.mxu1 %v3078_v23 }
  0xc8   : > { %1286 = vmatpush1.bf16.msra.mxu0 %v2988_v26  ;;  %v358_v26 = vld [vmem:[%s3578_s18 + $0x8] sm:$0xff]  ;;  %1168 = vmatprep.subr.bf16.mxu1 %v3079_v24 }
  0xc9   : > { %1287 = vmatprep.subr.bf16.mxu0 %v2989_v27  ;;  %v3019_v27 = vld [vmem:[#allocation4 + $0x260] ss:$8 sps:$4 sm:$0xff]  }
  0xca   : > { %v3043_v24 = vld [vmem:[#allocation4 + $0x2e0] ss:$8 sps:$4 sm:$0xff]  }
  0xcc   : > { %1288 = vmatpush1.bf16.msra.mxu0 %v2991_v28  ;;  %v500_v28 = vpack.c.bf16 %v423_v22, %v416_v21 }
  0xcd   : > { %1289 = vmatprep.subr.bf16.mxu0 %v2992_v29  ;;  %v365_v29 = vld [vmem:[%s3578_s18 + $0x40] sm:$0xff] }
  0xce   : > { %v470_v32 = vpack.c.bf16 %v365_v29, %v358_v26  ;;  %v3050_v26 = vld [vmem:[#allocation4 + $0x2f4] ss:$8 sps:$4 sm:$0xff]   ;;  %v386_v29 = vld [vmem:[%s3578_s18 + $0xe8] sm:$0xff] }
  0xd0   : > { %1290 = vmatpush1.bf16.msra.mxu0 %v2994_v30  ;;  %v3024_v30 = vld [vmem:[#allocation4 + $0x274] ss:$8 sps:$4 sm:$0xff]   ;;  %1182 = vmatprep.mubr.bf16.mxu1 %v470_v32 }
  0xd1   : > { %1291 = vmatprep.subr.bf16.mxu0 %v2995_v31  ;;  %v3081_v31 = vld [vmem:[#allocation4 + $0x90] ss:$8 sps:$4 sm:$0xff]  }
  0xd2   : > { %1169 = vmatpush1.bf16.msra.mxu1 %v3081_v31  ;;  %v3100_v31 = vld [vmem:[#allocation6 + $0x40] sm:$0xff]  }
  0xd3   : > { %1170 = vmatprep.subr.bf16.mxu1 %v3082_v33  ;;  %v3101_v32 = vld [vmem:[#allocation6] sm:$0xff]   ;;  %v3102_v33 = vld [vmem:[#allocation6 + $0x48] sm:$0xff]  }
  0xd4   : > { %1292 = vmatpush1.bf16.msra.mxu0 %v2997_v34  ;;  %v3022_v34 = vld [vmem:[#allocation4 + $0x270] ss:$8 sps:$4 sm:$0xff]  }
  0xd5   : > { %1293 = vmatprep.subr.bf16.mxu0 %v2998_v35  ;;  %v415_v35 = vld [vmem:[%s3578_s18 + $0x1d0] sm:$0xff] }
  0xd6   : > { %v499_v42 = vpack.c.bf16 %v422_v36, %v415_v35  ;;  %v361_v35 = vld [vmem:[%s3578_s18 + $0x20] sm:$0xff]  ;;  %v368_v36 = vld [vmem:[%s3578_s18 + $0x58] sm:$0xff] }
  0xd8   : > { %1294 = vmatpush1.bf16.msra.mxu0 %v3000_v37  ;;  %v3027_v37 = vld [vmem:[#allocation4 + $0x284] ss:$8 sps:$4 sm:$0xff]  }
  0xd9   : > { %1376 = vmatprep.subr.bf16.mxu0 %v3003_v40  ;;  %v3084_v40 = vld [vmem:[#allocation4 + $0xa0] ss:$8 sps:$4 sm:$0xff]  }
  0xda   : > { %1171 = vmatpush1.bf16.msra.mxu1 %v3084_v40  ;;  %v383_v40 = vld [vmem:[%s3578_s18 + $0xd0] sm:$0xff] }
  0xdb   : > { %1296 = vmatmul.mubr.bf16.vlgmr.msra.gmra.mrb[0].mxu0 %v471_v47  ;;  %v3028_v47 = vld [vmem:[#allocation4 + $0x290] ss:$8 sps:$4 sm:$0xff]   ;;  %1172 = vmatprep.subr.bf16.mxu1 %v3085_v41 }
  0xdc   : > { %1377 = vmatpush1.bf16.msra.mxu0 %v3001_v48  ;;  %1305 = vmatprep.mubr.bf16.mxu0 %v479_v49  ;;  %v429_v48 = vld [vmem:[%s3578_s18 + $0x240] sm:$0xff]  ;;  %v436_v49 = vld [vmem:[%s3578_s18 + $0x278] sm:$0xff] }
  0xdd   : > { %1378 = vmatprep.subr.bf16.mxu0 %v3006_v50  ;;  %v3088_v50 = vld [vmem:[#allocation4 + $0xc4] ss:$8 sps:$4 sm:$0xff]   ;;  %v506_v57 = vpack.c.bf16 %v436_v49, %v429_v48  ;;  %v392_v48 = vld [vmem:[%s3578_s18 + $0x118] sm:$0xff] }
  0xde   : > { %1173 = vmatpush1.bf16.msra.mxu1 %v3087_v46  ;;  %v481_v46 = vpack.c.bf16 %v383_v40, %v376_v39  ;;  %v400_v49 = vld [vmem:[%s3578_s18 + $0x158] sm:$0xff]  ;;  %v441_v39 = vld [vmem:[%s3578_s18 + $0x2a0] sm:$0xff] }
  0xdf   : > { %1174 = vmatprep.subr.bf16.mxu1 %v3088_v50  ;;  %v407_v50 = vld [vmem:[%s3578_s18 + $0x190] sm:$0xff]  ;;  %v448_v40 = vld [vmem:[%s3578_s18 + $0x2d8] sm:$0xff] }
  0xe0   : > { %1379 = vmatpush1.bf16.msra.mxu0 %v3004_v52  ;;  %v444_v52 = vld [vmem:[%s3578_s18 + $0x2b8] sm:$0xff] }
  0xe1   : > { %1380 = vmatprep.subr.bf16.mxu0 %v3009_v56  ;;  %v3031_v56 = vld [vmem:[#allocation4 + $0x2a0] ss:$8 sps:$4 sm:$0xff]   ;;  %v514_v60 = vpack.c.bf16 %v451_v53, %v444_v52  ;;  %v375_v53 = vld [vmem:[%s3578_s18 + $0x90] sm:$0xff] }
  0xe2   : > { %1175 = vmatpush1.bf16.msra.mxu1 %v3090_v54  ;;  %v3106_v52 = vld [vmem:[#allocation6 + $0x58] sm:$0xff]  }
  0xe3   : > { %1306 = vmatmul.mubr.bf16.gmra.mrb[4].mxu0 %v478_v61  ;;  %v3034_v61 = vld [vmem:[#allocation4 + $0x2b0] ss:$8 sps:$4 sm:$0xff]   ;;  %1176 = vmatprep.subr.bf16.mxu1 %v3091_v55  ;;  %v382_v54 = vld [vmem:[%s3578_s18 + $0xc8] sm:$0xff] }
  0xe4   : > { %1381 = vmatpush1.bf16.msra.mxu0 %v3007_v62  ;;  %1315 = vmatprep.mubr.bf16.mxu0 %v486_v63  ;;  %v443_v62 = vld [vmem:[%s3578_s18 + $0x2b0] sm:$0xff]  ;;  %v450_v63 = vld [vmem:[%s3578_s18 + $0x2e8] sm:$0xff] }
  0xe5   : > { %1382 = vmatprep.subr.bf16.mxu0 %v3012_v0  ;;  %v3094_v0 = vld [vmem:[#allocation4 + $0xe4] ss:$8 sps:$4 sm:$0xff]   ;;  %v513_v7 = vpack.c.bf16 %v450_v63, %v443_v62  ;;  %v399_v63 = vld [vmem:[%s3578_s18 + $0x150] sm:$0xff] }
  0xe6   : > { %1177 = vmatpush1.bf16.msra.mxu1 %v3093_v59  ;;  %v3107_v59 = vld [vmem:[#allocation6 + $0x18] sm:$0xff]  }
  0xe7   : > { %1178 = vmatprep.subr.bf16.mxu1 %v3094_v0  ;;  %v406_v0 = vld [vmem:[%s3578_s18 + $0x188] sm:$0xff] }
  0xe8   : > { %1383 = vmatpush1.bf16.msra.mxu0 %v3010_v2  ;;  %v458_v2 = vld [vmem:[%s3578_s18 + $0x328] sm:$0xff] }
  0xe9   : > { %1384 = vmatprep.subr.bf16.mxu0 %v3015_v6  ;;  %v3037_v6 = vld [vmem:[#allocation4 + $0x2c0] ss:$8 sps:$4 sm:$0xff]  }
  0xea   : > { %1179 = vmatpush1.bf16.msra.mxu1 %v3096_v4  ;;  %v3110_v4 = vld [vmem:[#allocation6 + $0x68] sm:$0xff]  }
  0xeb   : > { %1316 = vmatmul.mubr.bf16.gmra.mrb[8].mxu0 %v485_v11  ;;  %v364_v11 = vld [vmem:[%s3578_s18 + $0x38] sm:$0xff]  ;;  %1180 = vmatprep.subr.bf16.mxu1 %v3097_v5  ;;  %v389_v5 = vld [vmem:[%s3578_s18 + $0x100] sm:$0xff] }
  0xec   : > { %1385 = vmatpush1.bf16.msra.mxu0 %v3013_v12  ;;  %1325 = vmatprep.mubr.bf16.mxu0 %v493_v13  ;;  %v521_v12 = vpack.c.bf16 %v465_v3, %v458_v2  ;;  %v3040_v13 = vld [vmem:[#allocation4 + $0x2d0] ss:$8 sps:$4 sm:$0xff]   ;;  %v469_v21 = vpack.c.bf16 %v364_v11, %v357_v10  ;;  %v421_v2 = vld [vmem:[%s3578_s18 + $0x200] sm:$0xff] }
  0xed   : > { %1386 = vmatprep.subr.bf16.mxu0 %v3018_v14  ;;  %v457_v14 = vld [vmem:[%s3578_s18 + $0x320] sm:$0xff]  ;;  %v3109_v3 = vld [vmem:[#allocation6 + $0x20] sm:$0xff]   ;;  %v3111_v11 = vld [vmem:[#allocation6 + $0x28] sm:$0xff]  }
  0xee   : > { %1181 = vmatpush1.bf16.msra.mxu1 %v3099_v9  ;;  %v520_v23 = vpack.c.bf16 %v464_v17, %v457_v14  ;;  %v411_v9 = vld [vmem:[%s3578_s18 + $0x1b0] sm:$0xff]  ;;  %v428_v17 = vld [vmem:[%s3578_s18 + $0x238] sm:$0xff] }
  0xef   : > { %2575 = vmatprep.subr.bf16.mxu1 %v3100_v31  ;;  %v417_v31 = vld [vmem:[%s3578_s18 + $0x1e0] sm:$0xff] }
  0xf0   : > { %1387 = vmatpush1.bf16.msra.mxu0 %v3016_v16  ;;  %v379_v16 = vld [vmem:[%s3578_s18 + $0xb0] sm:$0xff] }
  0xf1   : > { %1388 = vmatprep.subr.bf16.mxu0 %v3021_v20  ;;  %v369_v20 = vld [vmem:[%s3578_s18 + $0x60] sm:$0xff]  ;;  %v477_v22 = vpack.c.bf16 %v379_v16, %v372_v15  ;;  %1183 = vmatmul.mubr.bf16.vlgmr.msra.gmra.mrb[0].mxu1 %v469_v21  ;;  %v420_v16 = vld [vmem:[%s3578_s18 + $0x1f8] sm:$0xff] }
  0xf2   : > { %2576 = vmatpush3.bf16.msra.mxu1 %v3101_v32  ;;  %v413_v15 = vld [vmem:[%s3578_s18 + $0x1c0] sm:$0xff]  ;;  %v424_v32 = vld [vmem:[%s3578_s18 + $0x218] sm:$0xff] }
  0xf3   : > { %1326 = vmatmul.mubr.bf16.gmra.mrb[12].mxu0 %v492_v25  ;;  %v474_v25 = vpack.c.bf16 %v369_v20, %v362_v19  ;;  %1192 = vmatprep.mubr.bf16.mxu1 %v477_v22  ;;  %v403_v19 = vld [vmem:[%s3578_s18 + $0x170] sm:$0xff]  ;;  %v410_v20 = vld [vmem:[%s3578_s18 + $0x1a8] sm:$0xff]  ;;  %v497_v21 = vpack.c.bf16 %v420_v16, %v413_v15  ;;  %v433_v16 = vld [vmem:[%s3578_s18 + $0x260] sm:$0xff] }
  0xf4   : > { %1389 = vmatpush1.bf16.msra.mxu0 %v3019_v27  ;;  %1335 = vmatprep.mubr.bf16.mxu0 %v500_v28  ;;  %v371_v27 = vld [vmem:[%s3578_s18 + $0x70] sm:$0xff]  ;;  %v378_v28 = vld [vmem:[%s3578_s18 + $0xa8] sm:$0xff] }
  0xf5   : > { %1390 = vmatprep.subr.bf16.mxu0 %v3024_v30  ;;  %v393_v30 = vld [vmem:[%s3578_s18 + $0x120] sm:$0xff]  ;;  %2577 = vmatprep.subr.bf16.mxu1 %v3102_v33  ;;  %v418_v22 = vld [vmem:[%s3578_s18 + $0x1e8] sm:$0xff] }
  0xf6   : > { %v484_v41 = vpack.c.bf16 %v393_v30, %v386_v29  ;;  %v442_v29 = vld [vmem:[%s3578_s18 + $0x2a8] sm:$0xff]  ;;  %v449_v30 = vld [vmem:[%s3578_s18 + $0x2e0] sm:$0xff] }
  0xf8   : > { %1391 = vmatpush1.bf16.msra.mxu0 %v3022_v34  ;;  %v3048_v34 = vld [vmem:[#allocation4 + $0x2f0] ss:$8 sps:$4 sm:$0xff]  }
  0xf9   : > { %1392 = vmatprep.subr.bf16.mxu0 %v3027_v37  ;;  %v476_v37 = vpack.c.bf16 %v378_v28, %v371_v27  ;;  %v427_v27 = vld [vmem:[%s3578_s18 + $0x230] sm:$0xff]  ;;  %v434_v28 = vld [vmem:[%s3578_s18 + $0x268] sm:$0xff] }
  0xfa   : > { %v504_v33 = vpack.c.bf16 %v434_v28, %v427_v27 }
  0xfb   : > { %1336 = vmatmul.mubr.bf16.gmra.mrb[16].mxu0 %v499_v42  ;;  %v3103_v42 = vld [vmem:[#allocation6 + $0x8] sm:$0xff]   ;;  %1193 = vmatmul.mubr.bf16.gmra.mrb[4].mxu1 %v476_v37  ;;  %v501_v37 = vpack.c.bf16 %v424_v32, %v417_v31 }
  0xfc   : > { %1393 = vmatpush1.bf16.msra.mxu0 %v3025_v43  ;;  %1345 = vmatprep.mubr.bf16.mxu0 %v507_v44  ;;  %v473_v43 = vpack.c.bf16 %v368_v36, %v361_v35  ;;  %v3104_v44 = vld [vmem:[#allocation6 + $0x50] sm:$0xff]   ;;  %v439_v35 = vld [vmem:[%s3578_s18 + $0x290] sm:$0xff]  ;;  %v512_v36 = vpack.c.bf16 %v449_v30, %v442_v29 }
  0xfd   : > { %1394 = vmatprep.subr.bf16.mxu0 %v3030_v45  ;;  %v3054_v45 = vld [vmem:[#allocation4 + $0x300] ss:$8 sps:$4 sm:$0xff]   ;;  %1202 = vmatprep.mubr.bf16.mxu1 %v484_v41  ;;  %v456_v41 = vld [vmem:[%s3578_s18 + $0x318] sm:$0xff] }
  0xfe   : > { %2578 = vmatpush3.bf16.msra.mxu1 %v3103_v42  ;;  %v463_v42 = vld [vmem:[%s3578_s18 + $0x350] sm:$0xff] }
  0xff   : > { %2579 = vmatprep.subr.bf16.mxu1 %v3104_v44  ;;  %v438_v44 = vld [vmem:[%s3578_s18 + $0x288] sm:$0xff] }
 0x100   : > { %1395 = vmatpush1.bf16.msra.mxu0 %v3028_v47  ;;  %v385_v47 = vld [vmem:[%s3578_s18 + $0xe0] sm:$0xff] }
 0x101   : > { %1396 = vmatprep.subr.bf16.mxu0 %v3033_v51  ;;  %v3105_v51 = vld [vmem:[#allocation6 + $0x10] sm:$0xff]   ;;  %v483_v55 = vpack.c.bf16 %v392_v48, %v385_v47  ;;  %v519_v48 = vpack.c.bf16 %v463_v42, %v456_v41 }
 0x102   : > { %2580 = vmatpush3.bf16.msra.mxu1 %v3105_v51  ;;  %v453_v47 = vld [vmem:[%s3578_s18 + $0x300] sm:$0xff]  ;;  %v455_v51 = vld [vmem:[%s3578_s18 + $0x310] sm:$0xff] }
 0x103   : > { %1346 = vmatmul.mubr.bf16.gmra.mrb[20].mxu0 %v506_v57  ;;  %v397_v57 = vld [vmem:[%s3578_s18 + $0x140] sm:$0xff]  ;;  %2581 = vmatprep.subr.bf16.mxu1 %v3106_v52  ;;  %v462_v52 = vld [vmem:[%s3578_s18 + $0x348] sm:$0xff] }
 0x104   : > { %1397 = vmatpush1.bf16.msra.mxu0 %v3031_v56  ;;  %1355 = vmatprep.mubr.bf16.mxu0 %v514_v60  ;;  %v390_v56 = vld [vmem:[%s3578_s18 + $0x108] sm:$0xff]  ;;  %v480_v60 = vpack.c.bf16 %v382_v54, %v375_v53  ;;  %v445_v53 = vld [vmem:[%s3578_s18 + $0x2c0] sm:$0xff]  ;;  %v452_v54 = vld [vmem:[%s3578_s18 + $0x2f8] sm:$0xff] }
 0x105   : > { %1398 = vmatprep.subr.bf16.mxu0 %v3036_v58  ;;  %v491_v58 = vpack.c.bf16 %v407_v50, %v400_v49  ;;  %v488_v62 = vpack.c.bf16 %v397_v57, %v390_v56  ;;  %1203 = vmatmul.mubr.bf16.gmra.mrb[8].mxu1 %v483_v55  ;;  %v518_v55 = vpack.c.bf16 %v462_v52, %v455_v51  ;;  %v460_v56 = vld [vmem:[%s3578_s18 + $0x338] sm:$0xff]  ;;  %v467_v57 = vld [vmem:[%s3578_s18 + $0x370] sm:$0xff] }
 0x106   : > { %2582 = vmatpush3.bf16.msra.mxu1 %v3107_v59  ;;  %v523_v59 = vpack.c.bf16 %v467_v57, %v460_v56  ;;  %v625_v56 = vlaneseq }
 0x107   : > { %1212 = vmatprep.mubr.bf16.mxu1 %v491_v58  ;;  %v515_v58 = vpack.c.bf16 %v452_v54, %v445_v53 }
 0x108   : > { %1399 = vmatpush1.bf16.msra.mxu0 %v3034_v61  ;;  %v3108_v61 = vld [vmem:[#allocation6 + $0x60] sm:$0xff]  }
 0x109   : > { %1400 = vmatprep.subr.bf16.mxu0 %v3039_v1  ;;  %v414_v1 = vld [vmem:[%s3578_s18 + $0x1c8] sm:$0xff]  ;;  %2583 = vmatprep.subr.bf16.mxu1 %v3108_v61 }
 0x10a   : > { %v498_v10 = vpack.c.bf16 %v421_v2, %v414_v1  ;;  %2584 = vmatpush3.bf16.msra.mxu1 %v3109_v3  ;;  %v466_v61 = vld [vmem:[%s3578_s18 + $0x368] sm:$0xff]  ;;  %v377_v3 = vld [vmem:[%s3578_s18 + $0xa0] sm:$0xff] }
 0x10b   : > { %1356 = vmatmul.mubr.bf16.gmra.mrb[24].mxu0 %v513_v7  ;;  %v490_v7 = vpack.c.bf16 %v406_v0, %v399_v63  ;;  %2585 = vmatprep.subr.bf16.mxu1 %v3110_v4  ;;  %v3354_v63 = vmov 0   ;;  %v363_v0 = vld [vmem:[%s3578_s18 + $0x30] sm:$0xff]  ;;  %v370_v1 = vld [vmem:[%s3578_s18 + $0x68] sm:$0xff]  ;;  %v384_v4 = vld [vmem:[%s3578_s18 + $0xd8] sm:$0xff] }
 0x10c   : > { %1401 = vmatpush1.bf16.msra.mxu0 %v3037_v6  ;;  %1365 = vmatprep.mubr.bf16.mxu0 %v521_v12  ;;  %v396_v6 = vld [vmem:[%s3578_s18 + $0x138] sm:$0xff]  ;;  %v475_v2 = vpack.c.bf16 %v370_v1, %v363_v0 }
 0x10d   : > { %1402 = vmatprep.subr.bf16.mxu0 %v3042_v8  ;;  %v404_v8 = vld [vmem:[%s3578_s18 + $0x178] sm:$0xff]  ;;  %v487_v12 = vpack.c.bf16 %v396_v6, %v389_v5  ;;  %1213 = vmatmul.mubr.bf16.gmra.mrb[12].mxu1 %v490_v7  ;;  %v482_v5 = vpack.c.bf16 %v384_v4, %v377_v3  ;;  %v391_v6 = vld [vmem:[%s3578_s18 + $0x110] sm:$0xff]  ;;  %v398_v7 = vld [vmem:[%s3578_s18 + $0x148] sm:$0xff] }
 0x10e   : > { %v495_v14 = vpack.c.bf16 %v411_v9, %v404_v8  ;;  %1222 = vmatprep.mubr.bf16.mxu1 %v498_v10  ;;  %2586 = vmatpush3.bf16.msra.mxu1 %v3111_v11  ;;  %v3113_v8 = vld [vmem:[#allocation6 + $0x30] sm:$0xff]   ;;  %v489_v9 = vpack.c.bf16 %v398_v7, %v391_v6  ;;  %v412_v11 = vld [vmem:[%s3578_s18 + $0x1b8] sm:$0xff] }
 0x10f   : > { %v405_v10 = vld [vmem:[%s3578_s18 + $0x180] sm:$0xff] }
 0x110   : > { %1403 = vmatpush1.bf16.msra.mxu0 %v3040_v13  ;;  %v3112_v13 = vld [vmem:[#allocation6 + $0x70] sm:$0xff]  }
 0x111   : > { %1404 = vmatprep.subr.bf16.mxu0 %v3045_v18  ;;  %v435_v18 = vld [vmem:[%s3578_s18 + $0x270] sm:$0xff]  ;;  %2587 = vmatprep.subr.bf16.mxu1 %v3112_v13 }
 0x112   : > { %2588 = vmatpush3.bf16.msra.mxu1 %v3113_v8  ;;  %v419_v13 = vld [vmem:[%s3578_s18 + $0x1f0] sm:$0xff] }
 0x113   : > { %1366 = vmatmul.mubr.bf16.gmra.mrb[28].mxu0 %v520_v23  ;;  %v425_v23 = vld [vmem:[%s3578_s18 + $0x220] sm:$0xff] }
 0x114   : > { %1405 = vmatpush1.bf16.msra.mxu0 %v3043_v24  ;;  %1408 = vmatprep.mubr.bf16.mxu0 %v474_v25  ;;  %v505_v24 = vpack.c.bf16 %v435_v18, %v428_v17  ;;  %v494_v25 = vpack.c.bf16 %v410_v20, %v403_v19  ;;  %v440_v17 = vld [vmem:[%s3578_s18 + $0x298] sm:$0xff]  ;;  %v447_v19 = vld [vmem:[%s3578_s18 + $0x2d0] sm:$0xff]  ;;  %v454_v20 = vld [vmem:[%s3578_s18 + $0x308] sm:$0xff] }
 0x115   : > { %1406 = vmatprep.subr.bf16.mxu0 %v3050_v26  ;;  %v502_v26 = vpack.c.bf16 %v425_v23, %v418_v22  ;;  %1223 = vmatmul.mubr.bf16.gmra.mrb[16].mxu1 %v497_v21  ;;  %v510_v18 = vpack.c.bf16 %v440_v17, %v433_v16  ;;  %v517_v21 = vpack.c.bf16 %v454_v20, %v447_v19  ;;  %v461_v22 = vld [vmem:[%s3578_s18 + $0x340] sm:$0xff]  ;;  %v468_v23 = vld [vmem:[%s3578_s18 + $0x378] sm:$0xff] }
 0x116   : > { %1232 = vmatprep.mubr.bf16.mxu1 %v505_v24  ;;  %v524_v24 = vpack.c.bf16 %v468_v23, %v461_v22 }
 0x118   : > { %1407 = vmatpush1.bf16.msra.mxu0 %v3048_v34  ;;  %v432_v34 = vld [vmem:[%s3578_s18 + $0x258] sm:$0xff] }
 0x119   : > { %1489 = vmatprep.subr.bf16.mxu0 %v3056_v38  ;;  %v509_v38 = vpack.c.bf16 %v439_v35, %v432_v34  ;;  %v3712_v35 = vld [vmem:[#allocation7] sm:$0xff]  }
 0x11b   : > { %1409 = vmatmul.mubr.bf16.vlgmr.msra.gmra.mrb[0].mxu0 %v473_v43  ;;  %v431_v43 = vld [vmem:[%s3578_s18 + $0x250] sm:$0xff] }
 0x11c   : > { %1490 = vmatpush1.bf16.msra.mxu0 %v3054_v45  ;;  %1418 = vmatprep.mubr.bf16.mxu0 %v481_v46  ;;  %v511_v45 = vpack.c.bf16 %v448_v40, %v441_v39  ;;  %v446_v46 = vld [vmem:[%s3578_s18 + $0x2c8] sm:$0xff]  ;;  %v508_v49 = vpack.c.bf16 %v438_v44, %v431_v43 }
 0x11d   : > { %1233 = vmatmul.mubr.bf16.gmra.mrb[20].mxu1 %v504_v33  ;;  %v516_v50 = vpack.c.bf16 %v453_v47, %v446_v46 }
 0x11e   : > { %1242 = vmatprep.mubr.bf16.mxu1 %v512_v36 }
 0x123   : > { %1419 = vmatmul.mubr.bf16.gmra.mrb[4].mxu0 %v480_v60  ;;  %v459_v60 = vld [vmem:[%s3578_s18 + $0x330] sm:$0xff] }
 0x124   : > { %1428 = vmatprep.mubr.bf16.mxu0 %v488_v62  ;;  %v522_v62 = vpack.c.bf16 %v466_v61, %v459_v60  ;;  %v626_v61 = vshrl.u32 %v625_v56, 7 }
 0x125   : > { %1243 = vmatmul.mubr.bf16.gmra.mrb[24].mxu1 %v511_v45 }
 0x126   : > { %1252 = vmatprep.mubr.bf16.mxu1 %v519_v48  ;;  %v631_v0 = vsub.s32 1, %v626_v61 }
 0x12b   : > { %1429 = vmatmul.mubr.bf16.gmra.mrb[8].mxu0 %v487_v12  ;;  %v496_v12 = vpack.c.bf16 %v412_v11, %v405_v10 }
 0x12c   : > { %1438 = vmatprep.mubr.bf16.mxu0 %v495_v14  ;;  %v426_v14 = vld [vmem:[%s3578_s18 + $0x228] sm:$0xff] }
 0x12d   : > { %1253 = vmatmul.mubr.bf16.gmra.mrb[28].mxu1 %v518_v55  ;;  %v503_v15 = vpack.c.bf16 %v426_v14, %v419_v13 }
 0x133   : > { %1439 = vmatmul.mubr.bf16.gmra.mrb[12].mxu0 %v494_v25  ;;  %v3114_v25 = vld [vmem:[#allocation6 + $0x78] sm:$0xff]  }
 0x134   : > { %1448 = vmatprep.mubr.bf16.mxu0 %v502_v26  ;;  %v3115_v26 = vld [vmem:[#allocation6 + $0x38] sm:$0xff]   ;;  %2589 = vmatprep.subr.bf16.mxu1 %v3114_v25 }
 0x135   : > { %2590 = vmatpush3.bf16.msra.mxu1 %v3115_v26 }
 0x136   : > { %2655 = vmatprep.subr.bf16.mxu1 %v3712_v35 }
 0x13b   : > { %1449 = vmatmul.mubr.bf16.gmra.mrb[16].mxu0 %v501_v37 }
 0x13c   : > { %1458 = vmatprep.mubr.bf16.mxu0 %v509_v38 }
 0x143   : > { %1459 = vmatmul.mubr.bf16.gmra.mrb[20].mxu0 %v508_v49 }
 0x144   : > { %1468 = vmatprep.mubr.bf16.mxu0 %v516_v50 }
 0x14b   : > { %1469 = vmatmul.mubr.bf16.gmra.mrb[24].mxu0 %v515_v58 }
 0x14c   : > { %1478 = vmatprep.mubr.bf16.mxu0 %v523_v59 }
 0x153   : > { %1479 = vmatmul.mubr.bf16.gmra.mrb[28].mxu0 %v522_v62  ;;  %v627_v62 = vsub.s32 0, %v626_v61 }
 0x154   : > { %1521 = vmatprep.mubr.bf16.mxu0 %v3354_v63 }
 0x15b   : > { %2521 = vmatmul.mubr.msk.bf16.vlgmr.msra.gmra.mrb[0].mxu0 %vm1125_vm0, %v475_v2 }
 0x15c   : > { %1531 = vmatprep.mubr.bf16.mxu0 %v3354_v63 }
 0x163   : > { %2522 = vmatmul.mubr.msk.bf16.gmra.mrb[4].mxu0 %vm1125_vm0, %v482_v5 }
 0x164   : > { %1541 = vmatprep.mubr.bf16.mxu0 %v3354_v63 }
 0x16b   : > { %2523 = vmatmul.mubr.msk.bf16.gmra.mrb[8].mxu0 %vm1125_vm0, %v489_v9 }
 0x16c   : > { %1551 = vmatprep.mubr.bf16.mxu0 %v3354_v63 }
 0x173   : > { %2524 = vmatmul.mubr.msk.bf16.gmra.mrb[12].mxu0 %vm1125_vm0, %v496_v12 }
 0x174   : > { %1561 = vmatprep.mubr.bf16.mxu0 %v3354_v63 }
 0x17b   : > { %2525 = vmatmul.mubr.msk.bf16.gmra.mrb[16].mxu0 %vm1125_vm0, %v503_v15 }
 0x17c   : > { %1571 = vmatprep.mubr.bf16.mxu0 %v3354_v63 }
 0x183   : > { %2526 = vmatmul.mubr.msk.bf16.gmra.mrb[20].mxu0 %vm1125_vm0, %v510_v18 }
 0x184   : > { %1581 = vmatprep.mubr.bf16.mxu0 %v3354_v63 }
 0x18b   : > { %2527 = vmatmul.mubr.msk.bf16.gmra.mrb[24].mxu0 %vm1125_vm0, %v517_v21 }
 0x18c   : > { %1591 = vmatprep.mubr.bf16.mxu0 %v3354_v63  ;;  %v623_v63 = vld [vmem:[%s3975_s2] sm:$0x3] }
 0x18d   : > { %v3766_v1 = vrot.slane %v623_v63, %v627_v62  ;;  %v3768_v2 = vrot.slane %v623_v63, %v631_v0 }
 0x193   : > { %2528 = vmatmul.mubr.msk.bf16.gmra.mrb[28].mxu0 %vm1125_vm0, %v524_v24 }
 0x1c4   : > { %v1184_v27 = vpop.f32.mrb[0].mxu1 }
 0x1c5   : > { %v1186_v28 = vpop.f32.mrb[1].mxu1  ;;  %v1185_v3 = vadd.f32 %v1184_v27, %v3766_v1  ;;  %v3117_v27 = vld [vmem:[#allocation7 + $0x8] sm:$0xff]  }
 0x1c6   : > { %v1188_v29 = vpop.f32.mrb[2].mxu1  ;;  %v1187_v4 = vadd.f32 %v1186_v28, %v3768_v2 }
 0x1c7   : > { %v1190_v30 = vpop.f32.mrb[3].mxu1  ;;  %v1189_v6 = vadd.f32 %v1188_v29, %v3766_v1 }
 0x1c8   : > { %v1191_v9 = vadd.f32 %v1190_v30, %v3768_v2 }
 0x1ce   : > { %v1194_v31 = vpop.f32.mrb[4].mxu1 }
 0x1cf   : > { %v1196_v32 = vpop.f32.mrb[5].mxu1  ;;  %v1195_v17 = vadd.f32 %v1194_v31, %v3766_v1 }
 0x1d0   : > { %v1198_v33 = vpop.f32.mrb[6].mxu1  ;;  %v1197_v20 = vadd.f32 %v1196_v32, %v3768_v2 }
 0x1d1   : > { %v1200_v34 = vpop.f32.mrb[7].mxu1  ;;  %v1199_v24 = vadd.f32 %v1198_v33, %v3766_v1  ;;  %v3118_v33 = vld [vmem:[#allocation7 + $0x10] sm:$0xff]  }
 0x1d2   : > { %v1201_v28 = vadd.f32 %v1200_v34, %v3768_v2 }
 0x1d8   : > { %v3714_v36 = vpop.f32.mrb[8].mxu1 }
 0x1d9   : > { %v3717_v37 = vpop.f32.mrb[9].mxu1  ;;  %v1205_v63 = vadd.f32 %v3714_v36, %v3766_v1 }
 0x1da   : > { %v3719_v38 = vpop.f32.mrb[10].mxu1  ;;  %v1207_v34 = vadd.f32 %v3717_v37, %v3768_v2 }
 0x1db   : > { %v3721_v39 = vpop.f32.mrb[11].mxu1 }
 0x1dc   : > { %v1211_v36 = vadd.f32 %v3721_v39, %v3768_v2 }
 0x1e0   : > { %v3723_v40 = vpop.f32.mrb[12].mxu1 }
 0x1e1   : > { %v3725_v41 = vpop.f32.mrb[13].mxu1 }
 0x1e2   : > { %v3727_v42 = vpop.f32.mrb[14].mxu1 }
 0x1e3   : > { %v3729_v43 = vpop.f32.mrb[15].mxu1 }
 0x1e8   : > { %v3731_v44 = vpop.f32.mrb[16].mxu1 }
 0x1e9   : > { %v3733_v45 = vpop.f32.mrb[17].mxu1 }
 0x1ea   : > { %v3735_v46 = vpop.f32.mrb[18].mxu1 }
 0x1eb   : > { %v3737_v47 = vpop.f32.mrb[19].mxu1 }
 0x1f0   : > { %v3739_v48 = vpop.f32.mrb[20].mxu1 }
 0x1f1   : > { %v3741_v49 = vpop.f32.mrb[21].mxu1 }
 0x1f2   : > { %v3743_v50 = vpop.f32.mrb[22].mxu1 }
 0x1f3   : > { %v3745_v51 = vpop.f32.mrb[23].mxu1 }
 0x1f8   : > { %v3747_v52 = vpop.f32.mrb[24].mxu1 }
 0x1f9   : > { %v3749_v53 = vpop.f32.mrb[25].mxu1 }
 0x1fa   : > { %v3751_v54 = vpop.f32.mrb[26].mxu1 }
 0x1fb   : > { %v3753_v55 = vpop.f32.mrb[27].mxu1 }
 0x200   : > { %v3755_v57 = vpop.f32.mrb[28].mxu1 }
 0x201   : > { %v3757_v58 = vpop.f32.mrb[29].mxu1 }
 0x202   : > { %v3759_v59 = vpop.f32.mrb[30].mxu1 }
 0x203   : > { %v3761_v60 = vpop.f32.mrb[31].mxu1 }
 0x22e   : > { %v1523_v5 = vpop.f32.mrb[0].mxu0 }
 0x22f   : > { %v2688_v7 = vadd.f32 %v1523_v5, %v1185_v3  ;;  %v1525_v8 = vpop.f32.mrb[1].mxu0 }
 0x230   : > { %v2690_v10 = vadd.f32 %v1525_v8, %v1187_v4  ;;  %v1527_v11 = vpop.f32.mrb[2].mxu0 }
 0x231   : > { %v2692_v12 = vadd.f32 %v1527_v11, %v1189_v6  ;;  %v1529_v13 = vpop.f32.mrb[3].mxu0  ;;  %v1602_v15 = vmax.f32 %v2688_v7, 0.0  ;;  %v1209_v7 = vadd.f32 %v3719_v38, %v3766_v1 }
 0x232   : > { %v2694_v14 = vadd.f32 %v1529_v13, %v1191_v9  ;;  %v1603_v18 = vmax.f32 %v2690_v10, 0.0 }
 0x233   : > { %v1604_v16 = vmax.f32 %v2692_v12, 0.0 }
 0x234   : > { %v1605_v19 = vmax.f32 %v2694_v14, 0.0 }
 0x235   : > { %v1634_v21 = vpack.c.bf16 %v1604_v16, %v1602_v15  ;;  %v1215_v15 = vadd.f32 %v3723_v40, %v3766_v1 }
 0x236   : > { %v1635_v22 = vpack.c.bf16 %v1605_v19, %v1603_v18  ;;  %v1533_v23 = vpop.f32.mrb[4].mxu0 }
 0x237   : > { %v2696_v25 = vadd.f32 %v1533_v23, %v1195_v17  ;;  %v1535_v26 = vpop.f32.mrb[5].mxu0  ;;  %v1217_v17 = vadd.f32 %v3725_v41, %v3768_v2  ;;  %v1221_v23 = vadd.f32 %v3729_v43, %v3768_v2 }
 0x238   : > { %v2698_v29 = vadd.f32 %v1535_v26, %v1197_v20  ;;  %v1537_v30 = vpop.f32.mrb[6].mxu0  ;;  %1817 = vmatprep.mubr.bf16.mxu1 %v1635_v22  ;;  %v1219_v20 = vadd.f32 %v3727_v42, %v3766_v1  ;;  %v1227_v42 = vadd.f32 %v3733_v45, %v3768_v2 }
 0x239   : > { %v2700_v56 = vadd.f32 %v1537_v30, %v1199_v24  ;;  %v1539_v61 = vpop.f32.mrb[7].mxu0  ;;  %1818 = vmatmul.mubr.bf16.vlgmr.msra.gmra.mrb[32].mxu1 %v1634_v21  ;;  %v1606_v32 = vmax.f32 %v2696_v25, 0.0 }
 0x23a   : > { %v2702_v31 = vadd.f32 %v1539_v61, %v1201_v28  ;;  %2656 = vmatpush3.bf16.msra.mxu1 %v3712_v35  ;;  %v1607_v0 = vmax.f32 %v2698_v29, 0.0  ;;  %v1225_v29 = vadd.f32 %v3731_v44, %v3766_v1 }
 0x23b   : > { %v1608_v62 = vmax.f32 %v2700_v56, 0.0  ;;  %2657 = vmatprep.subr.bf16.mxu1 %v3117_v27 }
 0x23c   : > { %v1609_v3 = vmax.f32 %v2702_v31, 0.0 }
 0x23d   : > { %v1636_v4 = vpack.c.bf16 %v1608_v62, %v1606_v32  ;;  %v1229_v32 = vadd.f32 %v3735_v46, %v3766_v1  ;;  %v1237_v46 = vadd.f32 %v3741_v49, %v3768_v2 }
 0x23e   : > { %v1637_v5 = vpack.c.bf16 %v1609_v3, %v1607_v0  ;;  %v1543_v6 = vpop.f32.mrb[8].mxu0  ;;  %2658 = vmatpush3.bf16.msra.mxu1 %v3117_v27 }
 0x23f   : > { %v2704_v35 = vadd.f32 %v1543_v6, %v1205_v63  ;;  %v1545_v8 = vpop.f32.mrb[9].mxu0  ;;  %2659 = vmatprep.subr.bf16.mxu1 %v3118_v33  ;;  %v1235_v6 = vadd.f32 %v3739_v48, %v3766_v1 }
 0x240   : > { %v2706_v9 = vadd.f32 %v1545_v8, %v1207_v34  ;;  %v1547_v10 = vpop.f32.mrb[10].mxu0  ;;  %1825 = vmatprep.mubr.bf16.mxu1 %v1637_v5 }
 0x241   : > { %v2708_v11 = vadd.f32 %v1547_v10, %v1209_v7  ;;  %v1549_v12 = vpop.f32.mrb[11].mxu0  ;;  %1826 = vmatmul.mubr.bf16.gmra.mrb[36].mxu1 %v1636_v4  ;;  %v1610_v13 = vmax.f32 %v2704_v35, 0.0 }
 0x242   : > { %v2710_v37 = vadd.f32 %v1549_v12, %v1211_v36  ;;  %2660 = vmatpush3.bf16.msra.mxu1 %v3118_v33  ;;  %v1611_v38 = vmax.f32 %v2706_v9, 0.0  ;;  %v1231_v33 = vadd.f32 %v3737_v47, %v3768_v2  ;;  %v1239_v9 = vadd.f32 %v3743_v50, %v3766_v1 }
 0x243   : > { %v1612_v14 = vmax.f32 %v2708_v11, 0.0  ;;  %v1241_v12 = vadd.f32 %v3745_v51, %v3768_v2  ;;  %v1247_v50 = vadd.f32 %v3749_v53, %v3768_v2 }
 0x244   : > { %v1613_v16 = vmax.f32 %v2710_v37, 0.0 }
 0x245   : > { %v1638_v18 = vpack.c.bf16 %v1612_v14, %v1610_v13 }
 0x246   : > { %v1639_v39 = vpack.c.bf16 %v1613_v16, %v1611_v38  ;;  %v1553_v19 = vpop.f32.mrb[12].mxu0  ;;  %v1245_v16 = vadd.f32 %v3747_v52, %v3766_v1 }
 0x247   : > { %v2712_v21 = vadd.f32 %v1553_v19, %v1215_v15  ;;  %v1555_v22 = vpop.f32.mrb[13].mxu0 }
 0x248   : > { %v2714_v24 = vadd.f32 %v1555_v22, %v1217_v17  ;;  %v1557_v25 = vpop.f32.mrb[14].mxu0  ;;  %1833 = vmatprep.mubr.bf16.mxu1 %v1639_v39 }
 0x249   : > { %v2716_v40 = vadd.f32 %v1557_v25, %v1219_v20  ;;  %v1559_v26 = vpop.f32.mrb[15].mxu0  ;;  %1834 = vmatmul.mubr.bf16.gmra.mrb[40].mxu1 %v1638_v18  ;;  %v1614_v28 = vmax.f32 %v2712_v21, 0.0  ;;  %v1249_v20 = vadd.f32 %v3751_v54, %v3766_v1  ;;  %v1257_v54 = vadd.f32 %v3757_v58, %v3768_v2 }
 0x24a   : > { %v2718_v27 = vadd.f32 %v1559_v26, %v1221_v23  ;;  %v1615_v30 = vmax.f32 %v2714_v24, 0.0  ;;  %v1251_v23 = vadd.f32 %v3753_v55, %v3768_v2 }
 0x24b   : > { %v1616_v41 = vmax.f32 %v2716_v40, 0.0 }
 0x24c   : > { %v1617_v56 = vmax.f32 %v2718_v27, 0.0 }
 0x24d   : > { %v1640_v61 = vpack.c.bf16 %v1616_v41, %v1614_v28  ;;  %v1255_v28 = vadd.f32 %v3755_v57, %v3766_v1 }
 0x24e   : > { %v1641_v31 = vpack.c.bf16 %v1617_v56, %v1615_v30  ;;  %v1563_v43 = vpop.f32.mrb[16].mxu0 }
 0x24f   : > { %v2720_v62 = vadd.f32 %v1563_v43, %v1225_v29  ;;  %v1565_v63 = vpop.f32.mrb[17].mxu0  ;;  %v1261_v43 = vadd.f32 %v3761_v60, %v3768_v2  ;;  %v3121_v60 = vld [vmem:[#allocation7 + $0x28] sm:$0xff]   ;;  %v3122_v2 = vld [vmem:[#allocation7 + $0x30] sm:$0xff]  }
 0x250   : > { %v2722_v0 = vadd.f32 %v1565_v63, %v1227_v42  ;;  %v1567_v3 = vpop.f32.mrb[18].mxu0  ;;  %1841 = vmatprep.mubr.bf16.mxu1 %v1641_v31  ;;  %v1259_v42 = vadd.f32 %v3759_v59, %v3766_v1  ;;  %v3119_v59 = vld [vmem:[#allocation7 + $0x18] sm:$0xff]   ;;  %v3120_v1 = vld [vmem:[#allocation7 + $0x20] sm:$0xff]  }
 0x251   : > { %v2724_v44 = vadd.f32 %v1567_v3, %v1229_v32  ;;  %v1569_v34 = vpop.f32.mrb[19].mxu0  ;;  %1842 = vmatmul.mubr.bf16.gmra.mrb[44].mxu1 %v1640_v61  ;;  %v1618_v5 = vmax.f32 %v2720_v62, 0.0  ;;  %2661 = vmatprep.subr.bf16.mxu1 %v3119_v59 }
 0x252   : > { %v2726_v4 = vadd.f32 %v1569_v34, %v1231_v33  ;;  %v1619_v7 = vmax.f32 %v2722_v0, 0.0  ;;  %2662 = vmatpush3.bf16.msra.mxu1 %v3119_v59 }
 0x253   : > { %v1620_v45 = vmax.f32 %v2724_v44, 0.0  ;;  %2663 = vmatprep.subr.bf16.mxu1 %v3120_v1 }
 0x254   : > { %v1621_v35 = vmax.f32 %v2726_v4, 0.0 }
 0x255   : > { %v1642_v8 = vpack.c.bf16 %v1620_v45, %v1618_v5  ;;  %v3123_v5 = vld [vmem:[#allocation7 + $0x38] sm:$0xff]  }
 0x256   : > { %v1643_v36 = vpack.c.bf16 %v1621_v35, %v1619_v7  ;;  %v1573_v47 = vpop.f32.mrb[20].mxu0  ;;  %2664 = vmatpush3.bf16.msra.mxu1 %v3120_v1 }
 0x257   : > { %v2728_v10 = vadd.f32 %v1573_v47, %v1235_v6  ;;  %v1575_v11 = vpop.f32.mrb[21].mxu0  ;;  %2665 = vmatprep.subr.bf16.mxu1 %v3121_v60  ;;  %v3830_v6 = vld [vmem:[%s3977_s4] ss:$0 sm:$0xff] }
 0x258   : > { %v2730_v37 = vadd.f32 %v1575_v11, %v1237_v46  ;;  %v1577_v13 = vpop.f32.mrb[22].mxu0  ;;  %1849 = vmatprep.mubr.bf16.mxu1 %v1643_v36 }
 0x259   : > { %v2732_v48 = vadd.f32 %v1577_v13, %v1239_v9  ;;  %v1579_v14 = vpop.f32.mrb[23].mxu0  ;;  %1850 = vmatmul.mubr.bf16.gmra.mrb[48].mxu1 %v1642_v8  ;;  %v1622_v38 = vmax.f32 %v2728_v10, 0.0 }
 0x25a   : > { %v2734_v15 = vadd.f32 %v1579_v14, %v1241_v12  ;;  %v1623_v17 = vmax.f32 %v2730_v37, 0.0  ;;  %2666 = vmatpush3.bf16.msra.mxu1 %v3121_v60 }
 0x25b   : > { %v1624_v49 = vmax.f32 %v2732_v48, 0.0  ;;  %2667 = vmatprep.subr.bf16.mxu1 %v3122_v2 }
 0x25c   : > { %v1625_v18 = vmax.f32 %v2734_v15, 0.0 }
 0x25d   : > { %v1644_v39 = vpack.c.bf16 %v1624_v49, %v1622_v38 }
 0x25e   : > { %v1645_v19 = vpack.c.bf16 %v1625_v18, %v1623_v17  ;;  %v1583_v51 = vpop.f32.mrb[24].mxu0  ;;  %2668 = vmatpush3.bf16.msra.mxu1 %v3122_v2 }
 0x25f   : > { %v2736_v21 = vadd.f32 %v1583_v51, %v1245_v16  ;;  %v1585_v22 = vpop.f32.mrb[25].mxu0  ;;  %2669 = vmatprep.subr.bf16.mxu1 %v3123_v5 }
 0x260   : > { %v2738_v24 = vadd.f32 %v1585_v22, %v1247_v50  ;;  %v1587_v25 = vpop.f32.mrb[26].mxu0  ;;  %1857 = vmatprep.mubr.bf16.mxu1 %v1645_v19 }
 0x261   : > { %v2740_v52 = vadd.f32 %v1587_v25, %v1249_v20  ;;  %v1589_v40 = vpop.f32.mrb[27].mxu0  ;;  %1858 = vmatmul.mubr.bf16.gmra.mrb[52].mxu1 %v1644_v39  ;;  %v1626_v27 = vmax.f32 %v2736_v21, 0.0 }
 0x262   : > { %v2742_v26 = vadd.f32 %v1589_v40, %v1251_v23  ;;  %v1627_v41 = vmax.f32 %v2738_v24, 0.0  ;;  %2670 = vmatpush3.bf16.msra.mxu1 %v3123_v5 }
 0x263   : > { %v1628_v53 = vmax.f32 %v2740_v52, 0.0 }
 0x264   : > { %v1629_v29 = vmax.f32 %v2742_v26, 0.0 }
 0x265   : > { %v1646_v30 = vpack.c.bf16 %v1628_v53, %v1626_v27 }
 0x266   : > { %v1647_v56 = vpack.c.bf16 %v1629_v29, %v1627_v41  ;;  %v1593_v55 = vpop.f32.mrb[28].mxu0 }
 0x267   : > { %v2744_v61 = vadd.f32 %v1593_v55, %v1255_v28  ;;  %v1595_v31 = vpop.f32.mrb[29].mxu0 }
 0x268   : > { %v2746_v32 = vadd.f32 %v1595_v31, %v1257_v54  ;;  %v1597_v62 = vpop.f32.mrb[30].mxu0  ;;  %1865 = vmatprep.mubr.bf16.mxu1 %v1647_v56 }
 0x269   : > { %v2748_v57 = vadd.f32 %v1597_v62, %v1259_v42  ;;  %v1599_v63 = vpop.f32.mrb[31].mxu0  ;;  %1866 = vmatmul.mubr.bf16.gmra.mrb[56].mxu1 %v1646_v30  ;;  %v1630_v0 = vmax.f32 %v2744_v61, 0.0 }
 0x26a   : > { %v2750_v33 = vadd.f32 %v1599_v63, %v1261_v43  ;;  %v1631_v3 = vmax.f32 %v2746_v32, 0.0 }
 0x26b   : > { %v1632_v58 = vmax.f32 %v2748_v57, 0.0 }
 0x26c   : > { %v1633_v44 = vmax.f32 %v2750_v33, 0.0 }
 0x26d   : > { %v1648_v34 = vpack.c.bf16 %v1632_v58, %v1630_v0 }
 0x26e   : > { %v1649_v4 = vpack.c.bf16 %v1633_v44, %v1631_v3 }
 0x270   : > { %1873 = vmatprep.mubr.bf16.mxu1 %v1649_v4 }
 0x271   : > { %1874 = vmatmul.mubr.bf16.gmra.mrb[60].mxu1 %v1648_v34 }
 0x30c   : > { %v2591_v45 = vpop.f32.mrb[32].mxu1 }
 0x30d   : > { %v2592_v7 = vpop.f32.mrb[33].mxu1 }
 0x30e   : > { %v2593_v35 = vadd.f32 %v2592_v7, %v2591_v45  ;;  %v2594_v46 = vpop.f32.mrb[34].mxu1 }
 0x30f   : > { %v2595_v8 = vpop.f32.mrb[35].mxu1 }
 0x310   : > { %v1820_v36 = vadd.f32 %v2593_v35, %v3830_v6  ;;  %v2596_v47 = vadd.f32 %v2595_v8, %v2594_v46 }
 0x312   : > { %v1823_v9 = vadd.f32 %v2596_v47, %v3830_v6  ;;  %v1882_v10 = vmax.f32 %v1820_v36, 0.0 }
 0x314   : > { %v1883_v11 = vmax.f32 %v1823_v9, 0.0  ;;  %v2597_v12 = vpop.f32.mrb[36].mxu1 }
 0x315   : > { %v2598_v37 = vpop.f32.mrb[37].mxu1 }
 0x316   : > { %v2599_v13 = vadd.f32 %v2598_v37, %v2597_v12  ;;  %v2600_v48 = vpop.f32.mrb[38].mxu1  ;;  %v1898_v14 = vpack.c.bf16 %v1883_v11, %v1882_v10 }
 0x317   : > { %v2601_v15 = vpop.f32.mrb[39].mxu1 }
 0x318   : > { %v1828_v38 = vadd.f32 %v2599_v13, %v3830_v6  ;;  %v2602_v49 = vadd.f32 %v2601_v15, %v2600_v48  ;;  %2671 = vmatprep.mubr.bf16.mxu1 %v1898_v14 }
 0x31a   : > { %v1831_v16 = vadd.f32 %v2602_v49, %v3830_v6  ;;  %v1884_v17 = vmax.f32 %v1828_v38, 0.0 }
 0x31c   : > { %v1885_v18 = vmax.f32 %v1831_v16, 0.0  ;;  %v2603_v50 = vpop.f32.mrb[40].mxu1 }
 0x31d   : > { %v2604_v39 = vpop.f32.mrb[41].mxu1 }
 0x31e   : > { %v1899_v19 = vpack.c.bf16 %v1885_v18, %v1884_v17  ;;  %v2605_v51 = vadd.f32 %v2604_v39, %v2603_v50  ;;  %v2606_v20 = vpop.f32.mrb[42].mxu1 }
 0x31f   : > { %v2607_v21 = vpop.f32.mrb[43].mxu1 }
 0x320   : > { %v1836_v22 = vadd.f32 %v2605_v51, %v3830_v6  ;;  %v2608_v23 = vadd.f32 %v2607_v21, %v2606_v20  ;;  %2672 = vmatmul.mubr.bf16.vlgmr.msra.gmra.mrb[64].mxu1 %v1899_v19  ;;  %v2546_v20 = vld [vmem:[%s3979_s6] ss:$0 sm:$0xff] }
 0x322   : > { %v1839_v24 = vadd.f32 %v2608_v23, %v3830_v6  ;;  %v1886_v25 = vmax.f32 %v1836_v22, 0.0 }
 0x324   : > { %v1887_v52 = vmax.f32 %v1839_v24, 0.0  ;;  %v2609_v40 = vpop.f32.mrb[44].mxu1 }
 0x325   : > { %v2610_v26 = vpop.f32.mrb[45].mxu1 }
 0x326   : > { %v2611_v27 = vadd.f32 %v2610_v26, %v2609_v40  ;;  %v2612_v53 = vpop.f32.mrb[46].mxu1  ;;  %v1900_v28 = vpack.c.bf16 %v1887_v52, %v1886_v25 }
 0x327   : > { %v2613_v41 = vpop.f32.mrb[47].mxu1 }
 0x328   : > { %v1844_v29 = vadd.f32 %v2611_v27, %v3830_v6  ;;  %v2614_v54 = vadd.f32 %v2613_v41, %v2612_v53  ;;  %2675 = vmatprep.mubr.bf16.mxu1 %v1900_v28 }
 0x32a   : > { %v1847_v30 = vadd.f32 %v2614_v54, %v3830_v6  ;;  %v1888_v56 = vmax.f32 %v1844_v29, 0.0 }
 0x32c   : > { %v1889_v55 = vmax.f32 %v1847_v30, 0.0  ;;  %v2615_v42 = vpop.f32.mrb[48].mxu1 }
 0x32d   : > { %v2616_v61 = vpop.f32.mrb[49].mxu1 }
 0x32e   : > { %v2617_v31 = vadd.f32 %v2616_v61, %v2615_v42  ;;  %v2618_v43 = vpop.f32.mrb[50].mxu1  ;;  %v1901_v32 = vpack.c.bf16 %v1889_v55, %v1888_v56 }
 0x32f   : > { %v2619_v62 = vpop.f32.mrb[51].mxu1 }
 0x330   : > { %v1852_v57 = vadd.f32 %v2617_v31, %v3830_v6  ;;  %v2620_v63 = vadd.f32 %v2619_v62, %v2618_v43  ;;  %2676 = vmatmul.mubr.bf16.gmra.mrb[68].mxu1 %v1901_v32 }
 0x332   : > { %v1855_v33 = vadd.f32 %v2620_v63, %v3830_v6  ;;  %v1890_v0 = vmax.f32 %v1852_v57, 0.0 }
 0x334   : > { %v1891_v58 = vmax.f32 %v1855_v33, 0.0  ;;  %v2621_v3 = vpop.f32.mrb[52].mxu1 }
 0x335   : > { %v2622_v44 = vpop.f32.mrb[53].mxu1 }
 0x336   : > { %v2623_v34 = vadd.f32 %v2622_v44, %v2621_v3  ;;  %v2624_v4 = vpop.f32.mrb[54].mxu1  ;;  %v1902_v59 = vpack.c.bf16 %v1891_v58, %v1890_v0 }
 0x337   : > { %v2625_v1 = vpop.f32.mrb[55].mxu1 }
 0x338   : > { %v1860_v60 = vadd.f32 %v2623_v34, %v3830_v6  ;;  %v2626_v2 = vadd.f32 %v2625_v1, %v2624_v4  ;;  %2679 = vmatprep.mubr.bf16.mxu1 %v1902_v59 }
 0x33a   : > { %v1863_v5 = vadd.f32 %v2626_v2, %v3830_v6  ;;  %v1892_v45 = vmax.f32 %v1860_v60, 0.0 }
 0x33c   : > { %v1893_v7 = vmax.f32 %v1863_v5, 0.0  ;;  %v2627_v35 = vpop.f32.mrb[56].mxu1 }
 0x33d   : > { %v2628_v46 = vpop.f32.mrb[57].mxu1 }
 0x33e   : > { %v2629_v8 = vadd.f32 %v2628_v46, %v2627_v35  ;;  %v2630_v36 = vpop.f32.mrb[58].mxu1  ;;  %v1903_v47 = vpack.c.bf16 %v1893_v7, %v1892_v45 }
 0x33f   : > { %v2631_v9 = vpop.f32.mrb[59].mxu1 }
 0x340   : > { %v1868_v10 = vadd.f32 %v2629_v8, %v3830_v6  ;;  %v2632_v11 = vadd.f32 %v2631_v9, %v2630_v36  ;;  %2680 = vmatmul.mubr.bf16.gmra.mrb[72].mxu1 %v1903_v47 }
 0x342   : > { %v1871_v12 = vadd.f32 %v2632_v11, %v3830_v6  ;;  %v1894_v37 = vmax.f32 %v1868_v10, 0.0 }
 0x344   : > { %v1895_v13 = vmax.f32 %v1871_v12, 0.0  ;;  %v2633_v48 = vpop.f32.mrb[60].mxu1 }
 0x345   : > { %v2634_v14 = vpop.f32.mrb[61].mxu1 }
 0x346   : > { %v2635_v15 = vadd.f32 %v2634_v14, %v2633_v48  ;;  %v2636_v38 = vpop.f32.mrb[62].mxu1  ;;  %v1904_v49 = vpack.c.bf16 %v1895_v13, %v1894_v37 }
 0x347   : > { %v2637_v16 = vpop.f32.mrb[63].mxu1 }
 0x348   : > { %v1876_v17 = vadd.f32 %v2635_v15, %v3830_v6  ;;  %v2638_v18 = vadd.f32 %v2637_v16, %v2636_v38  ;;  %2683 = vmatprep.mubr.bf16.mxu1 %v1904_v49 }
 0x34a   : > { %v1879_v50 = vadd.f32 %v2638_v18, %v3830_v6  ;;  %v1896_v39 = vmax.f32 %v1876_v17, 0.0 }
 0x34c   : > { %v1897_v19 = vmax.f32 %v1879_v50, 0.0 }
 0x34e   : > { %v1905_v51 = vpack.c.bf16 %v1897_v19, %v1896_v39 }
 0x350   : > { %2684 = vmatmul.mubr.bf16.gmra.mrb[76].mxu1 %v1905_v51 }
 0x3f3   : > { %v2673_v21 = vpop.f32.mrb[64].mxu1 }
 0x3f4   : > { %v2020_v22 = vadd.f32 %v2673_v21, %v2546_v20  ;;  %v2011_v23 = vpop.f32.mrb[65].mxu1 }
 0x3f5   : > { %v2012_v24 = vadd.f32 %v2546_v20, %v2011_v23  ;;  %v2674_v25 = vpop.f32.mrb[66].mxu1 }
 0x3f6   : > { %2076 = vst [vmem:[%s3852_s27 + $0x10] sm:$0xff] %v2020_v22  ;;  %v2023_v6 = vadd.f32 %v2674_v25, %v2546_v20  ;;  %v2014_v52 = vpop.f32.mrb[67].mxu1 }
 0x3f7   : > { %2074 = vst [vmem:[%s3852_s27] sm:$0xff] %v2012_v24  ;;  %v2015_v40 = vadd.f32 %v2546_v20, %v2014_v52 }
 0x3f8   : > { %2077 = vst [vmem:[%s3852_s27 + $0x18] sm:$0xff] %v2023_v6 }
 0x3f9   : > { %2075 = vst [vmem:[%s3852_s27 + $0x8] sm:$0xff] %v2015_v40 }
 0x403   : > { %v2677_v26 = vpop.f32.mrb[68].mxu1 }
 0x404   : > { %v2036_v27 = vadd.f32 %v2677_v26, %v2546_v20  ;;  %v2027_v53 = vpop.f32.mrb[69].mxu1 }
 0x405   : > { %v2028_v28 = vadd.f32 %v2546_v20, %v2027_v53  ;;  %v2678_v41 = vpop.f32.mrb[70].mxu1 }
 0x406   : > { %2080 = vst [vmem:[%s3852_s27 + $0x30] sm:$0xff] %v2036_v27  ;;  %v2039_v29 = vadd.f32 %v2678_v41, %v2546_v20  ;;  %v2030_v54 = vpop.f32.mrb[71].mxu1 }
 0x407   : > { %2078 = vst [vmem:[%s3852_s27 + $0x20] sm:$0xff] %v2028_v28  ;;  %v2031_v30 = vadd.f32 %v2546_v20, %v2030_v54 }
 0x408   : > { %2081 = vst [vmem:[%s3852_s27 + $0x38] sm:$0xff] %v2039_v29 }
 0x409   : > { %2079 = vst [vmem:[%s3852_s27 + $0x28] sm:$0xff] %v2031_v30 }
 0x413   : > { %v2681_v56 = vpop.f32.mrb[72].mxu1 }
 0x414   : > { %v2052_v55 = vadd.f32 %v2681_v56, %v2546_v20  ;;  %v2043_v42 = vpop.f32.mrb[73].mxu1 }
 0x415   : > { %v2044_v61 = vadd.f32 %v2546_v20, %v2043_v42  ;;  %v2682_v31 = vpop.f32.mrb[74].mxu1 }
 0x416   : > { %2084 = vst [vmem:[%s3852_s27 + $0x50] sm:$0xff] %v2052_v55  ;;  %v2055_v43 = vadd.f32 %v2682_v31, %v2546_v20  ;;  %v2046_v32 = vpop.f32.mrb[75].mxu1 }
 0x417   : > { %2082 = vst [vmem:[%s3852_s27 + $0x40] sm:$0xff] %v2044_v61  ;;  %v2047_v62 = vadd.f32 %v2546_v20, %v2046_v32 }
 0x418   : > { %2085 = vst [vmem:[%s3852_s27 + $0x58] sm:$0xff] %v2055_v43 }
 0x419   : > { %2083 = vst [vmem:[%s3852_s27 + $0x48] sm:$0xff] %v2047_v62 }
 0x423   : > { %v2685_v57 = vpop.f32.mrb[76].mxu1  ;;  %2096 = sbr.rel (!%p4003_p9) target bundleno = 1115 (0x45b), region = 68 }
 0x424   : > { %v2068_v63 = vadd.f32 %v2685_v57, %v2546_v20  ;;  %v2059_v33 = vpop.f32.mrb[77].mxu1 }
 0x425   : > { %v2060_v0 = vadd.f32 %v2546_v20, %v2059_v33  ;;  %v2686_v58 = vpop.f32.mrb[78].mxu1 }
 0x426   : > { %2088 = vst [vmem:[%s3852_s27 + $0x70] sm:$0xff] %v2068_v63  ;;  %v2071_v3 = vadd.f32 %v2686_v58, %v2546_v20  ;;  %v2062_v44 = vpop.f32.mrb[79].mxu1 }
 0x427   : > { %2086 = vst [vmem:[%s3852_s27 + $0x60] sm:$0xff] %v2060_v0  ;;  %v2063_v34 = vadd.f32 %v2546_v20, %v2062_v44 }
 0x428   : > { %2089 = vst [vmem:[%s3852_s27 + $0x78] sm:$0xff] %v2071_v3 }
 0x429   : > { %2087 = vst [vmem:[%s3852_s27 + $0x68] sm:$0xff] %v2063_v34 }
 0x42a   : > { %s4015_s24 = smov (!%p2099_p12, %s2098_s24), 16 }
 0x42b   : > { %s2557_s9 = sshll.u32 %s4015_s24, 7 }
 0x42c   : > { %p2560_p0 = scmp.eq.s32.totalorder %s2557_s9, 0 }
 0x42d   : > { %s3883_s12 = sshrl.u32 (!%p2560_p0), %s4015_s24, 4 }
 0x42e   : > { %2107 = sbr.rel (%p2560_p0) target bundleno = 1115 (0x45b), region = 72  ;;  %p2561_p5 = scmp.le.s32.totalorder (!%p2560_p0), %s3883_s12, 0 }
 0x435   : > { %2331 = sbr.rel (%p2561_p5) target bundleno = 1094 (0x446), region = 154  ;;  %s4004_s28 = smov (!%p2561_p5), %s3877_s16 }
 0x436   : > { %s4005_s10 = smov (!%p2561_p5), %s3852_s27  ;;  %s3892_s21 = smov (!%p2561_p5), 0  }
 0x437   : > { %s3894_s8 = smov (!%p2561_p5), 0  }
 0x43c LB: >> { %v2199_v4 = vld [vmem:[%s3318_s10] sm:$0xff]  ;;  %v2201_v59 = vld [vmem:[%s3318_s10 + $0x8] sm:$0xff]  ;;  %v2203_v1 = vld [vmem:[%s3318_s10 + $0x10] sm:$0xff]  ;;  %s2231_s15 = sadd.s32 1, %s3322_s21  ;;  %s2193_s8 = sadd.s32 1, %s3326_s8   ;;  %s3326_s8 = sphi %s3894_s8, %s2193_s8   ;;  %s3322_s21 = sphi %s3892_s21, %s4006_s21   ;;  %s3318_s10 = sphi %s4005_s10, %s2236_s10   ;;  %s3314_s28 = sphi %s4004_s28, %s2237_s28  }
 0x43d   : >> { %2200 = vst [vmem:[%s3314_s28] sm:$0xff] %v2199_v4  ;;  %2202 = vst [vmem:[%s3314_s28 + $0x8] sm:$0xff] %v2201_v59  ;;  %v2205_v60 = vld [vmem:[%s3318_s10 + $0x18] sm:$0xff]  ;;  %v2207_v2 = vld [vmem:[%s3318_s10 + $0x20] sm:$0xff]  ;;  %p2232_p1 = scmp.ge.s32.totalorder %s2231_s15, %s3883_s12  ;;  %p2192_p4 = scmp.ge.s32.totalorder %s2193_s8, %s3883_s12 }
 0x43e   : >> { %2204 = vst [vmem:[%s3314_s28 + $0x10] sm:$0xff] %v2203_v1  ;;  %v2209_v5 = vld [vmem:[%s3318_s10 + $0x28] sm:$0xff]  ;;  %2206 = vst [vmem:[%s3314_s28 + $0x18] sm:$0xff] %v2205_v60  ;;  %v2211_v45 = vld [vmem:[%s3318_s10 + $0x30] sm:$0xff] }
 0x43f   : >> { %2208 = vst [vmem:[%s3314_s28 + $0x20] sm:$0xff] %v2207_v2  ;;  %2210 = vst [vmem:[%s3314_s28 + $0x28] sm:$0xff] %v2209_v5  ;;  %v2213_v7 = vld [vmem:[%s3318_s10 + $0x38] sm:$0xff]  ;;  %v2215_v35 = vld [vmem:[%s3318_s10 + $0x40] sm:$0xff]  ;;  %s4017_s15 = smov (%p2232_p1, %s2231_s15), 0  ;;  %2195 = sbr.rel (!%p2192_p4) target bundleno = 1084 (0x43c), region = 160 }
 0x440   : >> { %2212 = vst [vmem:[%s3314_s28 + $0x30] sm:$0xff] %v2211_v45  ;;  %2214 = vst [vmem:[%s3314_s28 + $0x38] sm:$0xff] %v2213_v7  ;;  %v2217_v46 = vld [vmem:[%s3318_s10 + $0x48] sm:$0xff]  ;;  %v2219_v8 = vld [vmem:[%s3318_s10 + $0x50] sm:$0xff]  ;;  %s2562_s18 = sshll.u32 %s4017_s15, 7  ;;  %s4006_s21 = smov %s4017_s15 }
 0x441   : >> { %2216 = vst [vmem:[%s3314_s28 + $0x40] sm:$0xff] %v2215_v35  ;;  %v2221_v36 = vld [vmem:[%s3318_s10 + $0x58] sm:$0xff]  ;;  %2218 = vst [vmem:[%s3314_s28 + $0x48] sm:$0xff] %v2217_v46  ;;  %v2223_v47 = vld [vmem:[%s3318_s10 + $0x60] sm:$0xff] }
 0x442   : >> { %2220 = vst [vmem:[%s3314_s28 + $0x50] sm:$0xff] %v2219_v8  ;;  %2222 = vst [vmem:[%s3314_s28 + $0x58] sm:$0xff] %v2221_v36  ;;  %v2225_v9 = vld [vmem:[%s3318_s10 + $0x68] sm:$0xff]  ;;  %v2227_v10 = vld [vmem:[%s3318_s10 + $0x70] sm:$0xff] }
 0x443   : >> { %2224 = vst [vmem:[%s3314_s28 + $0x60] sm:$0xff] %v2223_v47  ;;  %2226 = vst [vmem:[%s3314_s28 + $0x68] sm:$0xff] %v2225_v9  ;;  %v2229_v11 = vld [vmem:[%s3318_s10 + $0x78] sm:$0xff]  ;;  %s2236_s10 = scalar_lea.vmem %s3852_s27, %s2562_s18 [#allocation9]  }
 0x444   : >> { %2228 = vst [vmem:[%s3314_s28 + $0x70] sm:$0xff] %v2227_v10  ;;  %2230 = vst [vmem:[%s3314_s28 + $0x78] sm:$0xff] %v2229_v11  ;;  %s2237_s28 = scalar_lea.vmem %s3877_s16, %s2562_s18  }
 0x446 PF: > { %s3952_s11 = sand.u32 15, %s4015_s24   ;;  %s2573_s13 = sshll.u32 %s3883_s12, 7 }
 0x447   : > { %s2242_s23 = scalar_lea.vmem %s3852_s27, %s2573_s13 [#allocation9]   ;;  %s2244_s30 = scalar_lea.vmem %s3877_s16, %s2573_s13  }
 0x448   : > { %p2567_p8 = scmp.le.s32.totalorder %s3952_s11, 0 }
 0x449   : > { %s3328_s29 = smov (!%p2567_p8), %s2244_s30   ;;  %s3332_s14 = smov (!%p2567_p8), %s2242_s23  }
 0x44a   : > { %2345 = sbr.rel (%p2567_p8) target bundleno = 1115 (0x45b), region = 165  ;;  %s3336_s17 = smov (!%p2567_p8), 0  }
 0x44b   : > { %s3340_s19 = smov (!%p2567_p8), 0  }
 0x451 LB: >> { %v2254_v12 = vld [vmem:[%s3334_s14] sm:$0xff]  ;;  %s2256_s1 = sadd.s32 1, %s3338_s17  ;;  %s2248_s19 = sadd.s32 1, %s3342_s19   ;;  %s3342_s19 = sphi %s3340_s19, %s2248_s19   ;;  %s3338_s17 = sphi %s3336_s17, %s3337_s17   ;;  %s3334_s14 = sphi %s3332_s14, %s2261_s14   ;;  %s3330_s29 = sphi %s3328_s29, %s2262_s29  }
 0x452   : >> { %2255 = vst [vmem:[%s3330_s29] sm:$0xff] %v2254_v12  ;;  %p2257_p11 = scmp.ge.s32.totalorder %s2256_s1, %s3952_s11  ;;  %p2247_p10 = scmp.ge.s32.totalorder %s2248_s19, %s3952_s11 }
 0x454   : >> { %s4019_s1 = smov (%p2257_p11, %s2256_s1), 0  ;;  %2250 = sbr.rel (!%p2247_p10) target bundleno = 1105 (0x451), region = 171 }
 0x455   : >> { %s2568_s27 = sshll.u32 %s4019_s1, 3  ;;  %s3337_s17 = smov %s4019_s1  }
 0x456   : >> { %s2261_s14 = scalar_lea.vmem %s2242_s23, %s2568_s27 [#allocation9]   ;;  %s2262_s29 = scalar_lea.vmem %s2244_s30, %s2568_s27  }
 0x45b PF: > { %s4007_s27 = sld [smem:[#allocation13_spill]]  ;;  %s4008_s20 = sld [smem:[#allocation14_spill]] }
 0x45c   : > { %s4009_s24 = smov %s3302_s25  ;;  %s4010_s25 = smov %s3306_s26 }
 0x461   : > { %p19_p2 = scmp.ge.s32.totalorder %s4007_s27, 4   ;;  %s4011_s26 = smov %s4008_s20 }
 0x463   :  { %21 = sbr.rel (!%p19_p2) target bundleno = 7 (0x7), region = 182 }
 0x46a   :  { %2278 = vsyncpa [#allocation3], 1 }
 0x46b   :  { %2280 = vsyncpa [#allocation3 + $0x1], 1 }
 0x46c   :  { %2281 = vsyncpa [#allocation5], 1 }
 0x46d   :  { %2282 = vsyncpa [#allocation8], 1 }

</bundles_post_ra>
